<compile_context>
chip_gen: v7x
topology: tpu7x:2x2x1
jax: 0.10.0
libtpu: 0.0.40
codegen_flags: <defaults>
</compile_context>

<pallas_src>
import functools

import jax
import jax.numpy as jnp
from jax import lax
from jax.experimental import pallas as pl
from jax.experimental.pallas import tpu as pltpu

MAXPAD = 8    # largest dilation among the dilated convs (2, 4, 8)
LANE = 128    # TPU lane width; time axis is padded to a multiple of this


def _leaky_relu(x, slope=0.2):
    return jnp.where(x >= 0, x, slope * x)


def _dblock_kernel(x_ref, gamma_ref, beta_ref,
                   w_res_ref, b_res_ref, w1_ref, b1_ref,
                   wdil_ref, bdil_ref, out_ref, scr_ref, *, c_in, valid_t):
    H = w_res_ref.shape[0]
    P = out_ref.shape[2]          # lane-padded output length (multiple of 128)
    M = MAXPAD

    xt = x_ref[0]                                  # (3*C_in, P) packed taps (raw x)

    # residual = Conv1d(k=1, stride=factor)(x): raw centre tap.
    res = jnp.dot(w_res_ref[...], xt[c_in:2 * c_in, :],
                  preferred_element_type=jnp.float32) + b_res_ref[...]

    # layer_1 = Conv1d(k=3, stride=factor, pad=1)(leaky_relu(x)) as ONE matmul
    # with contraction over all three taps (K = 3*C_in). leaky_relu(0) == 0,
    # so applying it to the zero-padded taps is exact.
    h = jnp.dot(w1_ref[...], _leaky_relu(xt),
                preferred_element_type=jnp.float32) + b1_ref[...]

    # FiLM conditioning.
    h = gamma_ref[0] * h + beta_ref[0]

    # Keep the lane-padding region of h at exactly zero so the dilated convs
    # see the same zero padding at the true sequence end as the reference.
    mask_needed = valid_t < P                      # static Python condition
    if mask_needed:
        lane_ok = lax.broadcasted_iota(jnp.int32, (H, P), 1) < valid_t
        h = jnp.where(lane_ok, h, 0.0)

    # Three dilated convs, each as ONE (H, 3H) @ (3H, P) matmul. The shifted
    # tap slab is staged in a persistent VMEM scratch; only the MAXPAD-wide
    # edge strips each layer reads are (re-)zeroed — never the full buffer.
    zeros_edge = jnp.zeros((H, MAXPAD), jnp.float32)
    for li, d in enumerate((2, 4, 8)):
        a = _leaky_relu(h)
        # zero edges first; the `a` stores below overwrite their overlap
        scr_ref[0:H, M:M + MAXPAD] = zeros_edge
        scr_ref[2 * H:3 * H, M + P - MAXPAD:M + P] = zeros_edge
        # slab row-block 0 holds a[t-d], block 1 holds a[t], block 2 holds a[t+d]
        scr_ref[0:H, M + d:M + d + P] = a
        scr_ref[H:2 * H, M:M + P] = a
        scr_ref[2 * H:3 * H, M - d:M - d + P] = a
        slab = scr_ref[:, M:M + P]                 # (3H, P)
        h = jnp.dot(wdil_ref[li], slab,
                    preferred_element_type=jnp.float32) + bdil_ref[li]
        if mask_needed and li < 2:                 # next layer mixes spatially
            h = jnp.where(lane_ok, h, 0.0)

    out_ref[0] = (h + res).astype(out_ref.dtype)


def dblock_forward(x, gamma, beta, params, factor):
    B, C_in, T = x.shape
    H = params["w_res"].shape[0]
    V = (T - 1) // factor + 1                          # true output length
    P = max(LANE, ((V + LANE - 1) // LANE) * LANE)     # lane-padded length

    # --- strided tap extraction (pure indexing glue), packed along channels ---
    # tap_k[t] = x_zeropad[k + factor*t], k in {0,1,2}, t in [0, P)
    need = factor * (P - 1) + 3
    pad_r = max(need - (T + 1), 1)
    xp = jnp.pad(x, ((0, 0), (0, 0), (1, pad_r)))
    taps = jnp.concatenate(
        [xp[:, :, k::factor][:, :, :P] for k in range(3)], axis=1)  # (B, 3*C_in, P)

    # --- repack weights for the tap-fused matmuls ---
    w_res = params["w_res"][:, :, 0]                                 # (H, C_in)
    b_res = params["b_res"][:, None]                                 # (H, 1)
    w1 = jnp.concatenate([params["w1"][:, :, k] for k in range(3)], axis=1)   # (H, 3*C_in)
    b1 = params["b1"][:, None]                                       # (H, 1)
    wdil = jnp.stack(
        [jnp.concatenate([params[f"w{i}"][:, :, k] for k in range(3)], axis=1)
         for i in (2, 3, 4)], axis=0)                                # (3, H, 3H)
    bdil = jnp.stack([params[f"b{i}"][:, None] for i in (2, 3, 4)], axis=0)   # (3, H, 1)

    kernel = functools.partial(_dblock_kernel, c_in=C_in, valid_t=V)

    out = pl.pallas_call(
        kernel,
        out_shape=jax.ShapeDtypeStruct((B, H, P), x.dtype),
        grid_spec=pltpu.PrefetchScalarGridSpec(
            num_scalar_prefetch=0,
            grid=(B,),
            in_specs=[
                pl.BlockSpec((1, 3 * C_in, P), lambda b: (b, 0, 0)),
                pl.BlockSpec((1, H, 1), lambda b: (b, 0, 0)),
                pl.BlockSpec((1, H, 1), lambda b: (b, 0, 0)),
                pl.BlockSpec((H, C_in), lambda b: (0, 0)),
                pl.BlockSpec((H, 1), lambda b: (0, 0)),
                pl.BlockSpec((H, 3 * C_in), lambda b: (0, 0)),
                pl.BlockSpec((H, 1), lambda b: (0, 0)),
                pl.BlockSpec((3, H, 3 * H), lambda b: (0, 0, 0)),
                pl.BlockSpec((3, H, 1), lambda b: (0, 0, 0)),
            ],
            out_specs=pl.BlockSpec((1, H, P), lambda b: (b, 0, 0)),
            scratch_shapes=[pltpu.VMEM((3 * H, P + 2 * MAXPAD), jnp.float32)],
        ),
        compiler_params=pltpu.CompilerParams(dimension_semantics=("parallel",)),
    )(taps, gamma, beta, w_res, b_res, w1, b1, wdil, bdil)

    return out[:, :, :V]


# ------------------------- pure-JAX reference ------------------------------
def _conv1d_ref(x, w, b, stride=1, padding=0, dilation=1):
    y = lax.conv_general_dilated(
        x, w, window_strides=(stride,), padding=[(padding, padding)],
        rhs_dilation=(dilation,), dimension_numbers=("NCH", "OIH", "NCH"),
        precision=lax.Precision.HIGHEST)
    return y + b[None, :, None]


def dblock_ref(x, gamma, beta, p, factor):
    res = _conv1d_ref(x, p["w_res"], p["b_res"], stride=factor)
    h = _leaky_relu(x)
    h = _conv1d_ref(h, p["w1"], p["b1"], stride=factor, padding=1)
    h = gamma * h + beta
    for i, d in zip((2, 3, 4), (2, 4, 8)):
        h = _leaky_relu(h)
        h = _conv1d_ref(h, p[f"w{i}"], p[f"b{i}"], padding=d, dilation=d)
    return h + res


if __name__ == "__main__":
    B, C_in, H, T, factor = 2, 4, 32, 16, 2

    key = jax.random.PRNGKey(0)
    ks = jax.random.split(key, 16)
    params = {
        "w_res": 0.1 * jax.random.normal(ks[0], (H, C_in, 1), jnp.float32),
        "b_res": 0.1 * jax.random.normal(ks[1], (H,), jnp.float32),
        "w1":    0.1 * jax.random.normal(ks[2], (H, C_in, 3), jnp.float32),
        "b1":    0.1 * jax.random.normal(ks[3], (H,), jnp.float32),
        "w2":    0.1 * jax.random.normal(ks[4], (H, H, 3), jnp.float32),
        "b2":    0.1 * jax.random.normal(ks[5], (H,), jnp.float32),
        "w3":    0.1 * jax.random.normal(ks[6], (H, H, 3), jnp.float32),
        "b3":    0.1 * jax.random.normal(ks[7], (H,), jnp.float32),
        "w4":    0.1 * jax.random.normal(ks[8], (H, H, 3), jnp.float32),
        "b4":    0.1 * jax.random.normal(ks[9], (H,), jnp.float32),
    }
    x = jax.random.normal(ks[10], (B, C_in, T), jnp.float32)
    gamma = jax.random.normal(ks[11], (B, H, 1), jnp.float32)
    beta = jax.random.normal(ks[12], (B, H, 1), jnp.float32)

    out = dblock_forward(x, gamma, beta, params, factor)
    out = jax.block_until_ready(out)

    ref = dblock_ref(x, gamma, beta, params, factor)
    assert out.shape == ref.shape == (B, H, (T - 1) // factor + 1), (out.shape, ref.shape)
    # Kernel matmuls run at default MXU precision (bf16 passes) per the perf
    # review; reference is HIGHEST-precision f32, so the tolerance is set for
    # bf16-level rounding across the 5 chained convs (values are O(1)).
    err = float(jnp.max(jnp.abs(out - ref)))
    assert jnp.allclose(out, ref, atol=5e-2, rtol=5e-2), err

    print("KERNEL_OK")
</pallas_src>

<mosaic_0001>
module attributes {stable_mosaic.version = 11 : i64} {
  func.func @_dblock_kernel(%arg0: i32, %arg1: memref<1x12x128xf32, #tpu.memory_space<vmem>>, %arg2: memref<1x32x1xf32, #tpu.memory_space<vmem>>, %arg3: memref<1x32x1xf32, #tpu.memory_space<vmem>>, %arg4: memref<32x4xf32, #tpu.memory_space<vmem>>, %arg5: memref<32x1xf32, #tpu.memory_space<vmem>>, %arg6: memref<32x12xf32, #tpu.memory_space<vmem>>, %arg7: memref<32x1xf32, #tpu.memory_space<vmem>>, %arg8: memref<3x32x96xf32, #tpu.memory_space<vmem>>, %arg9: memref<3x32x1xf32, #tpu.memory_space<vmem>>, %arg10: memref<1x32x128xf32, #tpu.memory_space<vmem>>, %arg11: memref<96x144xf32, #tpu.memory_space<vmem>>) attributes {dimension_semantics = [#tpu.dimension_semantics<parallel>], iteration_bounds = array<i64: 2>, scalar_prefetch = 0 : i64, scratch_operands = 1 : i64, tpu.core_type = #tpu.core_type<tc>, window_params = [{transform_indices = @transform_0, window_bounds = array<i64: 1, 12, 128>}, {transform_indices = @transform_1, window_bounds = array<i64: 1, 32, 1>}, {transform_indices = @transform_2, window_bounds = array<i64: 1, 32, 1>}, {pipeline_mode = #tpu.pipeline_mode<synchronous>, transform_indices = @transform_3, window_bounds = array<i64: 32, 4>}, {pipeline_mode = #tpu.pipeline_mode<synchronous>, transform_indices = @transform_4, window_bounds = array<i64: 32, 1>}, {pipeline_mode = #tpu.pipeline_mode<synchronous>, transform_indices = @transform_5, window_bounds = array<i64: 32, 12>}, {pipeline_mode = #tpu.pipeline_mode<synchronous>, transform_indices = @transform_6, window_bounds = array<i64: 32, 1>}, {pipeline_mode = #tpu.pipeline_mode<synchronous>, transform_indices = @transform_7, window_bounds = array<i64: 3, 32, 96>}, {pipeline_mode = #tpu.pipeline_mode<synchronous>, transform_indices = @transform_8, window_bounds = array<i64: 3, 32, 1>}, {transform_indices = @transform_9, window_bounds = array<i64: 1, 32, 128>}]} {
    %c0 = arith.constant 0 : index
    %c0_0 = arith.constant 0 : index
    %c0_1 = arith.constant 0 : index
    %0 = vector.load %arg1[%c0, %c0_0, %c0_1] : memref<1x12x128xf32, #tpu.memory_space<vmem>>, vector<1x12x128xf32>
    %1 = vector.shape_cast %0 : vector<1x12x128xf32> to vector<12x128xf32>
    %c0_2 = arith.constant 0 : index
    %c0_3 = arith.constant 0 : index
    %2 = vector.load %arg4[%c0_2, %c0_3] : memref<32x4xf32, #tpu.memory_space<vmem>>, vector<32x4xf32>
    %3 = vector.extract_strided_slice %1 {offsets = [4, 0], sizes = [4, 128], strides = [1, 1]} : vector<12x128xf32> to vector<4x128xf32>
    %cst = arith.constant dense<0.000000e+00> : vector<32x128xf32>
    %4 = tpu.matmul %2, %3, %cst {dimension_numbers = #tpu.dot_dimension_numbers<[1], [0], [0], [1], [0, 0, 1, 1], [], []>} : vector<32x4xf32>, vector<4x128xf32>, vector<32x128xf32> -> vector<32x128xf32>
    %c0_4 = arith.constant 0 : index
    %c0_5 = arith.constant 0 : index
    %5 = vector.load %arg5[%c0_4, %c0_5] : memref<32x1xf32, #tpu.memory_space<vmem>>, vector<32x1xf32>
    %6 = vector.broadcast %5 : vector<32x1xf32> to vector<32x128xf32>
    %7 = arith.addf %4, %6 : vector<32x128xf32>
    %c0_6 = arith.constant 0 : index
    %c0_7 = arith.constant 0 : index
    %8 = vector.load %arg6[%c0_6, %c0_7] : memref<32x12xf32, #tpu.memory_space<vmem>>, vector<32x12xf32>
    %cst_8 = arith.constant 0.000000e+00 : f32
    %9 = vector.broadcast %cst_8 : f32 to vector<12x128xf32>
    %10 = arith.cmpf oge, %1, %9 : vector<12x128xf32>
    %cst_9 = arith.constant 2.000000e-01 : f32
    %11 = vector.broadcast %cst_9 : f32 to vector<12x128xf32>
    %12 = arith.mulf %11, %1 : vector<12x128xf32>
    %13 = arith.select %10, %1, %12 : vector<12x128xi1>, vector<12x128xf32>
    %cst_10 = arith.constant dense<0.000000e+00> : vector<32x128xf32>
    %14 = tpu.matmul %8, %13, %cst_10 {dimension_numbers = #tpu.dot_dimension_numbers<[1], [0], [0], [1], [0, 0, 1, 1], [], []>} : vector<32x12xf32>, vector<12x128xf32>, vector<32x128xf32> -> vector<32x128xf32>
    %c0_11 = arith.constant 0 : index
    %c0_12 = arith.constant 0 : index
    %15 = vector.load %arg7[%c0_11, %c0_12] : memref<32x1xf32, #tpu.memory_space<vmem>>, vector<32x1xf32>
    %16 = vector.broadcast %15 : vector<32x1xf32> to vector<32x128xf32>
    %17 = arith.addf %14, %16 : vector<32x128xf32>
    %c0_13 = arith.constant 0 : index
    %c0_14 = arith.constant 0 : index
    %c0_15 = arith.constant 0 : index
    %18 = vector.load %arg2[%c0_13, %c0_14, %c0_15] : memref<1x32x1xf32, #tpu.memory_space<vmem>>, vector<1x32x1xf32>
    %19 = vector.shape_cast %18 : vector<1x32x1xf32> to vector<32x1xf32>
    %20 = vector.broadcast %19 : vector<32x1xf32> to vector<32x128xf32>
    %21 = arith.mulf %20, %17 : vector<32x128xf32>
    %c0_16 = arith.constant 0 : index
    %c0_17 = arith.constant 0 : index
    %c0_18 = arith.constant 0 : index
    %22 = vector.load %arg3[%c0_16, %c0_17, %c0_18] : memref<1x32x1xf32, #tpu.memory_space<vmem>>, vector<1x32x1xf32>
    %23 = vector.shape_cast %22 : vector<1x32x1xf32> to vector<32x1xf32>
    %24 = vector.broadcast %23 : vector<32x1xf32> to vector<32x128xf32>
    %25 = arith.addf %21, %24 : vector<32x128xf32>
    %26 = tpu.iota {dimensions = array<i32: 1>} : vector<32x128xi32>
    %c8_i32 = arith.constant 8 : i32
    %27 = vector.broadcast %c8_i32 : i32 to vector<32x128xi32>
    %28 = arith.cmpi slt, %26, %27 : vector<32x128xi32>
    %cst_19 = arith.constant 0.000000e+00 : f32
    %29 = vector.broadcast %cst_19 : f32 to vector<32x128xf32>
    %30 = arith.select %28, %25, %29 : vector<32x128xi1>, vector<32x128xf32>
    %cst_20 = arith.constant 0.000000e+00 : f32
    %31 = vector.broadcast %cst_20 : f32 to vector<32x8xf32>
    %cst_21 = arith.constant 0.000000e+00 : f32
    %32 = vector.broadcast %cst_21 : f32 to vector<32x128xf32>
    %33 = arith.cmpf oge, %30, %32 : vector<32x128xf32>
    %cst_22 = arith.constant 2.000000e-01 : f32
    %34 = vector.broadcast %cst_22 : f32 to vector<32x128xf32>
    %35 = arith.mulf %34, %30 : vector<32x128xf32>
    %36 = arith.select %33, %30, %35 : vector<32x128xi1>, vector<32x128xf32>
    %c0_23 = arith.constant 0 : index
    %c8 = arith.constant 8 : index
    %37 = vector.load %arg11[%c0_23, %c8] : memref<96x144xf32, #tpu.memory_space<vmem>>, vector<32x8xf32>
    tpu.vector_store %arg11[%c0_23, %c8], %31 {strides = array<i32>} : memref<96x144xf32, #tpu.memory_space<vmem>>, vector<32x8xf32>,
    %c64 = arith.constant 64 : index
    %c128 = arith.constant 128 : index
    %38 = vector.load %arg11[%c64, %c128] : memref<96x144xf32, #tpu.memory_space<vmem>>, vector<32x8xf32>
    tpu.vector_store %arg11[%c64, %c128], %31 {strides = array<i32>} : memref<96x144xf32, #tpu.memory_space<vmem>>, vector<32x8xf32>,
    %c0_24 = arith.constant 0 : index
    %c10 = arith.constant 10 : index
    %39 = vector.load %arg11[%c0_24, %c10] : memref<96x144xf32, #tpu.memory_space<vmem>>, vector<32x128xf32>
    tpu.vector_store %arg11[%c0_24, %c10], %36 {strides = array<i32>} : memref<96x144xf32, #tpu.memory_space<vmem>>, vector<32x128xf32>,
    %c32 = arith.constant 32 : index
    %c8_25 = arith.constant 8 : index
    %40 = vector.load %arg11[%c32, %c8_25] : memref<96x144xf32, #tpu.memory_space<vmem>>, vector<32x128xf32>
    tpu.vector_store %arg11[%c32, %c8_25], %36 {strides = array<i32>} : memref<96x144xf32, #tpu.memory_space<vmem>>, vector<32x128xf32>,
    %c64_26 = arith.constant 64 : index
    %c6 = arith.constant 6 : index
    %41 = vector.load %arg11[%c64_26, %c6] : memref<96x144xf32, #tpu.memory_space<vmem>>, vector<32x128xf32>
    tpu.vector_store %arg11[%c64_26, %c6], %36 {strides = array<i32>} : memref<96x144xf32, #tpu.memory_space<vmem>>, vector<32x128xf32>,
    %c0_27 = arith.constant 0 : index
    %c8_28 = arith.constant 8 : index
    %42 = vector.load %arg11[%c0_27, %c8_28] : memref<96x144xf32, #tpu.memory_space<vmem>>, vector<96x128xf32>
    %c0_29 = arith.constant 0 : index
    %c0_30 = arith.constant 0 : index
    %c0_31 = arith.constant 0 : index
    %43 = vector.load %arg8[%c0_29, %c0_30, %c0_31] : memref<3x32x96xf32, #tpu.memory_space<vmem>>, vector<1x32x96xf32>
    %44 = vector.shape_cast %43 : vector<1x32x96xf32> to vector<32x96xf32>
    %cst_32 = arith.constant dense<0.000000e+00> : vector<32x128xf32>
    %45 = tpu.matmul %44, %42, %cst_32 {dimension_numbers = #tpu.dot_dimension_numbers<[1], [0], [0], [1], [0, 0, 1, 1], [], []>} : vector<32x96xf32>, vector<96x128xf32>, vector<32x128xf32> -> vector<32x128xf32>
    %c0_33 = arith.constant 0 : index
    %c0_34 = arith.constant 0 : index
    %c0_35 = arith.constant 0 : index
    %46 = vector.load %arg9[%c0_33, %c0_34, %c0_35] : memref<3x32x1xf32, #tpu.memory_space<vmem>>, vector<1x32x1xf32>
    %47 = vector.shape_cast %46 : vector<1x32x1xf32> to vector<32x1xf32>
    %48 = vector.broadcast %47 : vector<32x1xf32> to vector<32x128xf32>
    %49 = arith.addf %45, %48 : vector<32x128xf32>
    %cst_36 = arith.constant 0.000000e+00 : f32
    %50 = vector.broadcast %cst_36 : f32 to vector<32x128xf32>
    %51 = arith.select %28, %49, %50 : vector<32x128xi1>, vector<32x128xf32>
    %cst_37 = arith.constant 0.000000e+00 : f32
    %52 = vector.broadcast %cst_37 : f32 to vector<32x128xf32>
    %53 = arith.cmpf oge, %51, %52 : vector<32x128xf32>
    %cst_38 = arith.constant 2.000000e-01 : f32
    %54 = vector.broadcast %cst_38 : f32 to vector<32x128xf32>
    %55 = arith.mulf %54, %51 : vector<32x128xf32>
    %56 = arith.select %53, %51, %55 : vector<32x128xi1>, vector<32x128xf32>
    %c0_39 = arith.constant 0 : index
    %c8_40 = arith.constant 8 : index
    %57 = vector.load %arg11[%c0_39, %c8_40] : memref<96x144xf32, #tpu.memory_space<vmem>>, vector<32x8xf32>
    tpu.vector_store %arg11[%c0_39, %c8_40], %31 {strides = array<i32>} : memref<96x144xf32, #tpu.memory_space<vmem>>, vector<32x8xf32>,
    %c64_41 = arith.constant 64 : index
    %c128_42 = arith.constant 128 : index
    %58 = vector.load %arg11[%c64_41, %c128_42] : memref<96x144xf32, #tpu.memory_space<vmem>>, vector<32x8xf32>
    tpu.vector_store %arg11[%c64_41, %c128_42], %31 {strides = array<i32>} : memref<96x144xf32, #tpu.memory_space<vmem>>, vector<32x8xf32>,
    %c0_43 = arith.constant 0 : index
    %c12 = arith.constant 12 : index
    %59 = vector.load %arg11[%c0_43, %c12] : memref<96x144xf32, #tpu.memory_space<vmem>>, vector<32x128xf32>
    tpu.vector_store %arg11[%c0_43, %c12], %56 {strides = array<i32>} : memref<96x144xf32, #tpu.memory_space<vmem>>, vector<32x128xf32>,
    %c32_44 = arith.constant 32 : index
    %c8_45 = arith.constant 8 : index
    %60 = vector.load %arg11[%c32_44, %c8_45] : memref<96x144xf32, #tpu.memory_space<vmem>>, vector<32x128xf32>
    tpu.vector_store %arg11[%c32_44, %c8_45], %56 {strides = array<i32>} : memref<96x144xf32, #tpu.memory_space<vmem>>, vector<32x128xf32>,
    %c64_46 = arith.constant 64 : index
    %c4 = arith.constant 4 : index
    %61 = vector.load %arg11[%c64_46, %c4] : memref<96x144xf32, #tpu.memory_space<vmem>>, vector<32x128xf32>
    tpu.vector_store %arg11[%c64_46, %c4], %56 {strides = array<i32>} : memref<96x144xf32, #tpu.memory_space<vmem>>, vector<32x128xf32>,
    %c0_47 = arith.constant 0 : index
    %c8_48 = arith.constant 8 : index
    %62 = vector.load %arg11[%c0_47, %c8_48] : memref<96x144xf32, #tpu.memory_space<vmem>>, vector<96x128xf32>
    %c1 = arith.constant 1 : index
    %c0_49 = arith.constant 0 : index
    %c0_50 = arith.constant 0 : index
    %63 = vector.load %arg8[%c1, %c0_49, %c0_50] : memref<3x32x96xf32, #tpu.memory_space<vmem>>, vector<1x32x96xf32>
    %64 = vector.shape_cast %63 : vector<1x32x96xf32> to vector<32x96xf32>
    %cst_51 = arith.constant dense<0.000000e+00> : vector<32x128xf32>
    %65 = tpu.matmul %64, %62, %cst_51 {dimension_numbers = #tpu.dot_dimension_numbers<[1], [0], [0], [1], [0, 0, 1, 1], [], []>} : vector<32x96xf32>, vector<96x128xf32>, vector<32x128xf32> -> vector<32x128xf32>
    %c1_52 = arith.constant 1 : index
    %c0_53 = arith.constant 0 : index
    %c0_54 = arith.constant 0 : index
    %66 = vector.load %arg9[%c1_52, %c0_53, %c0_54] : memref<3x32x1xf32, #tpu.memory_space<vmem>>, vector<1x32x1xf32>
    %67 = vector.shape_cast %66 : vector<1x32x1xf32> to vector<32x1xf32>
    %68 = vector.broadcast %67 : vector<32x1xf32> to vector<32x128xf32>
    %69 = arith.addf %65, %68 : vector<32x128xf32>
    %cst_55 = arith.constant 0.000000e+00 : f32
    %70 = vector.broadcast %cst_55 : f32 to vector<32x128xf32>
    %71 = arith.select %28, %69, %70 : vector<32x128xi1>, vector<32x128xf32>
    %cst_56 = arith.constant 0.000000e+00 : f32
    %72 = vector.broadcast %cst_56 : f32 to vector<32x128xf32>
    %73 = arith.cmpf oge, %71, %72 : vector<32x128xf32>
    %cst_57 = arith.constant 2.000000e-01 : f32
    %74 = vector.broadcast %cst_57 : f32 to vector<32x128xf32>
    %75 = arith.mulf %74, %71 : vector<32x128xf32>
    %76 = arith.select %73, %71, %75 : vector<32x128xi1>, vector<32x128xf32>
    %c0_58 = arith.constant 0 : index
    %c8_59 = arith.constant 8 : index
    %77 = vector.load %arg11[%c0_58, %c8_59] : memref<96x144xf32, #tpu.memory_space<vmem>>, vector<32x8xf32>
    tpu.vector_store %arg11[%c0_58, %c8_59], %31 {strides = array<i32>} : memref<96x144xf32, #tpu.memory_space<vmem>>, vector<32x8xf32>,
    %c64_60 = arith.constant 64 : index
    %c128_61 = arith.constant 128 : index
    %78 = vector.load %arg11[%c64_60, %c128_61] : memref<96x144xf32, #tpu.memory_space<vmem>>, vector<32x8xf32>
    tpu.vector_store %arg11[%c64_60, %c128_61], %31 {strides = array<i32>} : memref<96x144xf32, #tpu.memory_space<vmem>>, vector<32x8xf32>,
    %c0_62 = arith.constant 0 : index
    %c16 = arith.constant 16 : index
    %79 = vector.load %arg11[%c0_62, %c16] : memref<96x144xf32, #tpu.memory_space<vmem>>, vector<32x128xf32>
    tpu.vector_store %arg11[%c0_62, %c16], %76 {strides = array<i32>} : memref<96x144xf32, #tpu.memory_space<vmem>>, vector<32x128xf32>,
    %c32_63 = arith.constant 32 : index
    %c8_64 = arith.constant 8 : index
    %80 = vector.load %arg11[%c32_63, %c8_64] : memref<96x144xf32, #tpu.memory_space<vmem>>, vector<32x128xf32>
    tpu.vector_store %arg11[%c32_63, %c8_64], %76 {strides = array<i32>} : memref<96x144xf32, #tpu.memory_space<vmem>>, vector<32x128xf32>,
    %c64_65 = arith.constant 64 : index
    %c0_66 = arith.constant 0 : index
    %81 = vector.load %arg11[%c64_65, %c0_66] : memref<96x144xf32, #tpu.memory_space<vmem>>, vector<32x128xf32>
    tpu.vector_store %arg11[%c64_65, %c0_66], %76 {strides = array<i32>} : memref<96x144xf32, #tpu.memory_space<vmem>>, vector<32x128xf32>,
    %c0_67 = arith.constant 0 : index
    %c8_68 = arith.constant 8 : index
    %82 = vector.load %arg11[%c0_67, %c8_68] : memref<96x144xf32, #tpu.memory_space<vmem>>, vector<96x128xf32>
    %c2 = arith.constant 2 : index
    %c0_69 = arith.constant 0 : index
    %c0_70 = arith.constant 0 : index
    %83 = vector.load %arg8[%c2, %c0_69, %c0_70] : memref<3x32x96xf32, #tpu.memory_space<vmem>>, vector<1x32x96xf32>
    %84 = vector.shape_cast %83 : vector<1x32x96xf32> to vector<32x96xf32>
    %cst_71 = arith.constant dense<0.000000e+00> : vector<32x128xf32>
    %85 = tpu.matmul %84, %82, %cst_71 {dimension_numbers = #tpu.dot_dimension_numbers<[1], [0], [0], [1], [0, 0, 1, 1], [], []>} : vector<32x96xf32>, vector<96x128xf32>, vector<32x128xf32> -> vector<32x128xf32>
    %c2_72 = arith.constant 2 : index
    %c0_73 = arith.constant 0 : index
    %c0_74 = arith.constant 0 : index
    %86 = vector.load %arg9[%c2_72, %c0_73, %c0_74] : memref<3x32x1xf32, #tpu.memory_space<vmem>>, vector<1x32x1xf32>
    %87 = vector.shape_cast %86 : vector<1x32x1xf32> to vector<32x1xf32>
    %88 = vector.broadcast %87 : vector<32x1xf32> to vector<32x128xf32>
    %89 = arith.addf %85, %88 : vector<32x128xf32>
    %90 = arith.addf %89, %7 : vector<32x128xf32>
    %c0_75 = arith.constant 0 : index
    %c0_76 = arith.constant 0 : index
    %c0_77 = arith.constant 0 : index
    %91 = vector.load %arg10[%c0_75, %c0_76, %c0_77] : memref<1x32x128xf32, #tpu.memory_space<vmem>>, vector<1x32x128xf32>
    %92 = vector.shape_cast %91 : vector<1x32x128xf32> to vector<32x128xf32>
    %93 = vector.shape_cast %90 : vector<32x128xf32> to vector<1x32x128xf32>
    tpu.vector_store %arg10[%c0_75, %c0_76, %c0_77], %93 {strides = array<i32>} : memref<1x32x128xf32, #tpu.memory_space<vmem>>, vector<1x32x128xf32>,
    return
  }
  func.func @transform_0(%arg0: i32) -> (i32, i32, i32) {
    %c0_i32 = arith.constant 0 : i32
    %c0_i32_0 = arith.constant 0 : i32
    %c0_i32_1 = arith.constant 0 : i32
    return %arg0, %c0_i32, %c0_i32_0 : i32, i32, i32
  }
  func.func @transform_1(%arg0: i32) -> (i32, i32, i32) {
    %c0_i32 = arith.constant 0 : i32
    %c0_i32_0 = arith.constant 0 : i32
    %c0_i32_1 = arith.constant 0 : i32
    return %arg0, %c0_i32, %c0_i32_0 : i32, i32, i32
  }
  func.func @transform_2(%arg0: i32) -> (i32, i32, i32) {
    %c0_i32 = arith.constant 0 : i32
    %c0_i32_0 = arith.constant 0 : i32
    %c0_i32_1 = arith.constant 0 : i32
    return %arg0, %c0_i32, %c0_i32_0 : i32, i32, i32
  }
  func.func @transform_3(%arg0: i32) -> (i32, i32) {
    %c0_i32 = arith.constant 0 : i32
    %c0_i32_0 = arith.constant 0 : i32
    %c0_i32_1 = arith.constant 0 : i32
    return %c0_i32, %c0_i32_0 : i32, i32
  }
  func.func @transform_4(%arg0: i32) -> (i32, i32) {
    %c0_i32 = arith.constant 0 : i32
    %c0_i32_0 = arith.constant 0 : i32
    %c0_i32_1 = arith.constant 0 : i32
    return %c0_i32, %c0_i32_0 : i32, i32
  }
  func.func @transform_5(%arg0: i32) -> (i32, i32) {
    %c0_i32 = arith.constant 0 : i32
    %c0_i32_0 = arith.constant 0 : i32
    %c0_i32_1 = arith.constant 0 : i32
    return %c0_i32, %c0_i32_0 : i32, i32
  }
  func.func @transform_6(%arg0: i32) -> (i32, i32) {
    %c0_i32 = arith.constant 0 : i32
    %c0_i32_0 = arith.constant 0 : i32
    %c0_i32_1 = arith.constant 0 : i32
    return %c0_i32, %c0_i32_0 : i32, i32
  }
  func.func @transform_7(%arg0: i32) -> (i32, i32, i32) {
    %c0_i32 = arith.constant 0 : i32
    %c0_i32_0 = arith.constant 0 : i32
    %c0_i32_1 = arith.constant 0 : i32
    %c0_i32_2 = arith.constant 0 : i32
    return %c0_i32, %c0_i32_0, %c0_i32_1 : i32, i32, i32
  }
  func.func @transform_8(%arg0: i32) -> (i32, i32, i32) {
    %c0_i32 = arith.constant 0 : i32
    %c0_i32_0 = arith.constant 0 : i32
    %c0_i32_1 = arith.constant 0 : i32
    %c0_i32_2 = arith.constant 0 : i32
    return %c0_i32, %c0_i32_0, %c0_i32_1 : i32, i32, i32
  }
  func.func @transform_9(%arg0: i32) -> (i32, i32, i32) {
    %c0_i32 = arith.constant 0 : i32
    %c0_i32_0 = arith.constant 0 : i32
    %c0_i32_1 = arith.constant 0 : i32
    return %arg0, %c0_i32, %c0_i32_0 : i32, i32, i32
  }
}

</mosaic_0001>

<bundles_post_ra>
// kernel: tpu_custom_call.1
= control target key start
LH: loop header
LB: loop body
LE: loop exit
PB: predicated region body
PF: predicated region fallthrough
CT: control target
= control target key end

     0   :  { %14 = vsyncpa [#allocation4], 0  ;;  %s2991_s0 = inlined_call_operand.vmem [shape: f32[2,12,128], index: 0, kind: input, shape index: {}]   ;;  %s2992_s1 = inlined_call_operand.vmem [shape: f32[2,32,1], index: 1, kind: input, shape index: {}]   ;;  %s2993_s2 = inlined_call_operand.vmem [shape: f32[2,32,1], index: 2, kind: input, shape index: {}]   ;;  %s2994_s3 = inlined_call_operand.vmem [shape: f32[32,4], index: 3, kind: input, shape index: {}]   ;;  %s2995_s4 = inlined_call_operand.vmem [shape: f32[32,1], index: 4, kind: input, shape index: {}]   ;;  %s2996_s5 = inlined_call_operand.vmem [shape: f32[32,12], index: 5, kind: input, shape index: {}]   ;;  %s2997_s6 = inlined_call_operand.vmem [shape: f32[32,1], index: 6, kind: input, shape index: {}]   ;;  %s2998_s7 = inlined_call_operand.vmem [shape: f32[3,32,96], index: 7, kind: input, shape index: {}]   ;;  %s2999_s8 = inlined_call_operand.vmem [shape: f32[3,32,1], index: 8, kind: input, shape index: {}]   ;;  %s3000_s9 = inlined_call_operand.hbm [shape: f32[2,32,128], index: 9, kind: output, shape index: {}]  }
   0x1   :  { %16 = vsyncpa [#allocation4 + $0x1], 0  ;;  %s2479_s30 = smov 0   ;;  %s2481_s10 = smov 0  }
   0x2   :  { %s2483_s11 = smov 0   ;;  %s2485_s12 = smov 0  }
   0x3 LB: > { %s2500_s13 = sadd.s32 4294967295, %s2415_s12   ;;  %s1806_s14 = sadd.s32 4294967294, %s2415_s12   ;;  %s2415_s12 = sphi %s2485_s12, %s3008_s12   ;;  %s2411_s11 = sphi %s2483_s11, %s3007_s11   ;;  %s2407_s10 = sphi %s2481_s10, %s3006_s10   ;;  %s2403_s30 = sphi %s2479_s30, %s3005_s30  }
   0x4   : > { %s2504_s15 = sadd.s32 1, %s2415_s12   ;;  %s233_s16 = sadd.s32 1, %s2411_s11 }
   0x5   : > { %s230_s17 = ssub.s32 %s2415_s12, %s2504_s15  ;;  %p243_p0 = scmp.ne.s32.totalorder %s2411_s11, %s2407_s10 }
   0x6   : > { %p231_p1 = scmp.eq.s32.totalorder %s230_s17, 0  ;;  %p244_p2 = scmp.eq.s32.totalorder %s2500_s13, 1 }
   0x7   : > { %p249_p3 = scmp.ne.s32.totalorder %s2407_s10, %s2403_s30  ;;  %p250_p4 = scmp.eq.s32.totalorder %s1806_s14, 1 }
   0x8   : > { %s2515_s18 = scalar_select %p231_p1, %s2411_s11, %s233_s16  }
   0x9   : > { %p2517_p5 = por %p244_p2, %p243_p0  ;;  %p2521_p6 = por %p250_p4, %p249_p3 }
   0xa   : > { %3001 = sst [smem:[#allocation6_spill]] %s2515_s18  ;;  %p1809_p7 = scmp.ge.s32.totalorder %s2415_s12, 1 }
   0xb   : > { %p310_p8 = scmp.lt.s32.totalorder %s2415_s12, 3 }
   0xd   : > { %p311_p9 = pnand %p1809_p7, %p310_p8 }
   0xe   : > { %p356_p10 = scmp.lt.s32.totalorder (!%p311_p9), %s2500_s13, 1  ;;  %v373_v0 = vld [vmem:[%s2994_s3] sm:$0xff] (!%p311_p9)  ;;  %vm403_vm0 = vcmask (!%p311_p9), 31744   ;;  %v2417_v1 = vmov (!%p311_p9), 0   ;;  %v515_v3 = vld [vmem:[%s2997_s6 + $0x8] sm:$0xff] (!%p311_p9)  ;;  %vm416_vm1 = vcmask (!%p311_p9), 1043456   ;;  %v695_v40 = vlaneseq (!%p311_p9) }
   0xf   : > { %314 = sbr.rel (%p311_p9) target bundleno = 1746 (0x6d2), region = 56  ;;  %1925 = vmatprep.mubr.msk.f32.mxu1 (!%p311_p9), %vm403_vm0, %v373_v0  ;;  %2172 = vset.pattern.permute.xlu1 (!%p311_p9), %v2417_v1  ;;  %v514_v2 = vld [vmem:[%s2997_s6] sm:$0xff] (!%p311_p9)  ;;  %v374_v10 = vld [vmem:[%s2994_s3 + $0x8] sm:$0xff] (!%p311_p9)  ;;  %v375_v13 = vld [vmem:[%s2994_s3 + $0x10] sm:$0xff] (!%p311_p9)  ;;  %vm2418_vm4 = vmmov (!%p311_p9), 1   ;;  %vm538_vm6 = vcmask (!%p311_p9), 97280  }
  0x10   : > { %2171 = vset.pattern.permute.xlu0 (!%p311_p9), %v2417_v1  ;;  %v516_v14 = vld [vmem:[%s2997_s6 + $0x10] sm:$0xff] (!%p311_p9)  ;;  %vm2032_vm5 = vmpackc.low (!%p311_p9), %vm416_vm1, %vm2418_vm4  ;;  %v376_v17 = vld [vmem:[%s2994_s3 + $0x18] sm:$0xff] (!%p311_p9)  ;;  %vm714_vm7 = vcmask (!%p311_p9), 130112   ;;  %v2419_v29 = vmov (!%p311_p9), 0.0   ;;  %v2617_v44 = vand.u32 (!%p311_p9), 127, %v695_v40  ;;  %vm719_vm8 = vcmask (!%p311_p9), 64512  }
  0x11   : > { %520 = vperm.xlu0 (!%p311_p9), %2171, %v514_v2   ;;  %v517_v18 = vld [vmem:[%s2997_s6 + $0x18] sm:$0xff] (!%p311_p9)  ;;  %v504_v19 = vld [vmem:[%s2996_s5] sm:$0xff] (!%p311_p9)  ;;  %v505_v21 = vld [vmem:[%s2996_s5 + $0x8] sm:$0xff] (!%p311_p9)  ;;  %716 = vst.msk [vmem:[#allocation2 + $0x10] sm:$0xff] (!%p311_p9), %vm714_vm7, %v2419_v29  ;;  %s2422_s22 = smov (!%p311_p9), 6   ;;  %vm740_vm14 = vcmask (!%p311_p9), 1047632  }
  0x12   : > { %v506_v23 = vld [vmem:[%s2996_s5 + $0x10] sm:$0xff] (!%p311_p9)  ;;  %v507_v25 = vld [vmem:[%s2996_s5 + $0x18] sm:$0xff] (!%p311_p9)  ;;  %715 = vst.msk [vmem:[#allocation2] sm:$0xff] (!%p311_p9), %vm714_vm7, %v2419_v29  ;;  %717 = vst.msk [vmem:[#allocation2 + $0x20] sm:$0xff] (!%p311_p9), %vm714_vm7, %v2419_v29  ;;  %vm697_vm9 = vcmp.lt.s32.totalorder (!%p311_p9), %v2617_v44, 8  ;;  %vm742_vm15 = vcmask (!%p311_p9), 80896  }
  0x13   : > { %718 = vst.msk [vmem:[#allocation2 + $0x30] sm:$0xff] (!%p311_p9), %vm714_vm7, %v2419_v29  ;;  %vm942_vm4 = vcmask (!%p311_p9), 785408   ;;  %s2424_s28 = smov (!%p311_p9), 12   ;;  %s2425_s29 = smov (!%p311_p9), 4  }
  0x14   : > { %720 = vst.msk [vmem:[#allocation2 + $0x88] sm:$0xff] (!%p311_p9), %vm719_vm8, %v2419_v29  ;;  %721 = vst.msk [vmem:[#allocation2 + $0x98] sm:$0xff] (!%p311_p9), %vm719_vm8, %v2419_v29  ;;  %s353_s18 = sand.u32 (!%p311_p9), 1, %s2407_s10   ;;  %s2427_s24 = smov (!%p311_p9), [#allocation3]  }
  0x15   : > { %525 = vperm.xlu0 (!%p311_p9), %2171, %v515_v3   ;;  %722 = vst.msk [vmem:[#allocation2 + $0xa8] sm:$0xff] (!%p311_p9), %vm719_vm8, %v2419_v29  ;;  %723 = vst.msk [vmem:[#allocation2 + $0xb8] sm:$0xff] (!%p311_p9), %vm719_vm8, %v2419_v29  ;;  %s1810_s25 = sshll.u32 (!%p311_p9), %s353_s18, 5 }
  0x16   : > { %s2533_s23 = scalar_select %p356_p10, %s2500_s13, 1 }
  0x18   : > { %s1860_s26 = sshll.u32 %s2533_s23, 4  ;;  %s1861_s27 = sshll.u32 %s2533_s23, 5 }
  0x19   : > { %s360_s14 = scalar_lea.vmem %s2991_s0, %s1860_s26  ;;  %s2546_s21 = scalar_lea.vmem %s2992_s1, %s1861_s27  ;;  %530 = vperm.xlu0 %2171, %v516_v14  }
  0x1a   : > { %v371_v4 = vld [vmem:[%s360_s14] sm:$0xff]  ;;  %v372_v5 = vld [vmem:[%s360_s14 + $0x8] sm:$0xf]  ;;  %s2568_s16 = scalar_lea.vmem %s2993_s2, %s1861_s27  ;;  %v641_v24 = vld [vmem:[%s2546_s21 + $0x10] sm:$0xff]  ;;  %s2423_s23 = smov 120  }
  0x1b   : > { %v639_v6 = vld [vmem:[%s2546_s21] sm:$0xff]  ;;  %v402_v7 = vrot.slane %v371_v4, 4  ;;  %vm508_vm2 = vcmp.ge.f32.partialorder %v371_v4, 0.0  ;;  %vm509_vm3 = vcmp.ge.f32.partialorder %v372_v5, 0.0  ;;  %v510_v8 = vmul.f32 0.2, %v371_v4 }
  0x1c   : > { %645 = vperm.xlu1 %2172, %v639_v6   ;;  %v511_v9 = vmul.f32 0.2, %v372_v5  ;;  %v640_v11 = vld [vmem:[%s2546_s21 + $0x8] sm:$0xff]  ;;  %v667_v20 = vld [vmem:[%s2568_s16] sm:$0xff]  ;;  %v642_v26 = vld [vmem:[%s2546_s21 + $0x18] sm:$0xff]  ;;  %s2420_s21 = smov 10  }
  0x1d   : > { %1923 = vmatprep.subr.msk.mxu1 %vm416_vm1, %v402_v7  ;;  %v512_v12 = vsel %vm508_vm2, %v371_v4, %v510_v8  ;;  %673 = vperm.xlu0 %2171, %v667_v20   ;;  %v668_v22 = vld [vmem:[%s2568_s16 + $0x8] sm:$0xff]  ;;  %v669_v27 = vld [vmem:[%s2568_s16 + $0x10] sm:$0xff]  ;;  %v670_v28 = vld [vmem:[%s2568_s16 + $0x18] sm:$0xff]  ;;  %s2421_s16 = smov 8   ;;  %vm783_vm2 = vcmask 1047600   ;;  %s2426_s27 = smov 16  }
  0x1e   : > { %1924 = vmatpush3.msk.msra.mxu1 %vm416_vm1, %v402_v7  ;;  %v513_v15 = vsel %vm509_vm3, %v372_v5, %v511_v9  ;;  %vm762_vm1 = vcmask 1047616   ;;  %vm785_vm3 = vcmask 48128   ;;  %s355_s26 = scalar_lea.vmem [#allocation3], %s1810_s25 }
  0x1f   : > { %1926 = vmatmul.mubr.msk.f32.vlgmr.msra.gmra.mrb[0].mxu1 %vm403_vm0, %v374_v10  ;;  %v2031_v16 = vpack.c.bf16 %v513_v15, %v512_v12 }
  0x20   : > { %650 = vperm.xlu1 %2172, %v640_v11   ;;  %1928 = vmatprep.mubr.msk.f32.mxu1 %vm403_vm0, %v375_v13 }
  0x21   : > { %2033 = vmatprep.subr.msk.bf16.mxu1 %vm2032_vm5, %v2031_v16  ;;  %655 = vperm.xlu0 %2171, %v641_v24  }
  0x22   : > { %2036 = vmatpush3.bf16.msk.msra.mxu1 %vm2032_vm5, %v2031_v16  ;;  %vm917_vm5 = vcmask 982016  }
  0x23   : > { %1929 = vmatmul.mubr.msk.f32.gmra.mrb[2].mxu1 %vm403_vm0, %v376_v17 }
  0x24   : > { %535 = vperm.xlu1 %2172, %v517_v18   ;;  %1935 = vmatprep.mubr.msk.f32.mxu1 %vm538_vm6, %v504_v19 }
  0x25   : > { %683 = vperm.xlu0 %2171, %v669_v27  }
  0x27   : > { %1936 = vmatmul.mubr.msk.f32.vlgmr.msra.gmra.mrb[4].mxu1 %vm538_vm6, %v505_v21 }
  0x28   : > { %678 = vperm.xlu1 %2172, %v668_v22   ;;  %1938 = vmatprep.mubr.msk.f32.mxu1 %vm538_vm6, %v506_v23 }
  0x2b   : > { %1939 = vmatmul.mubr.msk.f32.gmra.mrb[6].mxu1 %vm538_vm6, %v507_v25 }
  0x2c   : > { %660 = vperm.xlu1 %2172, %v642_v26  }
  0x30   : > { %688 = vperm.xlu1 %2172, %v670_v28  }
  0x90   : > { %v521_v31 = vpop.permute.xlu0 %520 }
  0x94   : > { %v526_v33 = vpop.permute.xlu0 %525 }
  0x98   : > { %v531_v35 = vpop.permute.xlu0 %530 }
  0x9b   : > { %v646_v30 = vpop.permute.xlu1 %645 }
  0x9c   : > { %v674_v41 = vpop.permute.xlu0 %673 }
  0x9f   : > { %v651_v32 = vpop.permute.xlu1 %650 }
  0xa0   : > { %v656_v49 = vpop.permute.xlu0 %655 }
  0xa3   : > { %v536_v34 = vpop.permute.xlu1 %535 }
  0xa4   : > { %v684_v0 = vpop.permute.xlu0 %683 }
  0xa7   : > { %v679_v38 = vpop.permute.xlu1 %678 }
  0xab   : > { %v661_v47 = vpop.permute.xlu1 %660 }
  0xaf   : > { %v689_v60 = vpop.permute.xlu1 %688 }
  0xf2   : > { %v2609_v36 = vpop.f32.mrb[0].mxu1 }
  0xf3   : > { %v2611_v37 = vpop.f32.mrb[1].mxu1 }
  0xf6   : > { %v2613_v39 = vpop.f32.mrb[2].mxu1 }
  0xf7   : > { %v2615_v42 = vpop.f32.mrb[3].mxu1 }
  0xfa   : > { %v1937_v43 = vpop.f32.mrb[4].mxu1 }
  0xfb   : > { %v626_v45 = vadd.f32 %v1937_v43, %v526_v33  ;;  %v620_v46 = vpop.f32.mrb[5].mxu1 }
  0xfc   : > { %v621_v48 = vadd.f32 %v620_v46, %v521_v31 }
  0xfd   : > { %v664_v50 = vmul.f32 %v651_v32, %v626_v45 }
  0xfe   : > { %v663_v51 = vmul.f32 %v646_v30, %v621_v48  ;;  %v1940_v52 = vpop.f32.mrb[6].mxu1 }
  0xff   : > { %v692_v53 = vadd.f32 %v679_v38, %v664_v50  ;;  %v636_v54 = vadd.f32 %v1940_v52, %v536_v34  ;;  %v630_v55 = vpop.f32.mrb[7].mxu1 }
 0x100   : > { %v691_v56 = vadd.f32 %v674_v41, %v663_v51  ;;  %v631_v57 = vadd.f32 %v630_v55, %v531_v35 }
 0x101   : > { %v666_v58 = vmul.f32 %v661_v47, %v636_v54  ;;  %v699_v59 = vsel %vm697_vm9, %v692_v53, 0.0 }
 0x102   : > { %v665_v61 = vmul.f32 %v656_v49, %v631_v57  ;;  %vm703_vm10 = vcmp.ge.f32.partialorder %v699_v59, 0.0  ;;  %v707_v62 = vmul.f32 0.2, %v699_v59  ;;  %v698_v63 = vsel %vm697_vm9, %v691_v56, 0.0 }
 0x103   : > { %v694_v1 = vadd.f32 %v689_v60, %v666_v58  ;;  %vm702_vm11 = vcmp.ge.f32.partialorder %v698_v63, 0.0  ;;  %v706_v2 = vmul.f32 0.2, %v698_v63 }
 0x104   : > { %v693_v3 = vadd.f32 %v684_v0, %v665_v61  ;;  %v711_v4 = vsel %vm703_vm10, %v699_v59, %v707_v62  ;;  %v817_v59 = vld [vmem:[%s2998_s7] sm:$0xff] }
 0x105   : > { %730 = vrot.lane.b32.xlu1 %v711_v4, %s2420_s21  ;;  %v710_v5 = vsel %vm702_vm11, %v698_v63, %v706_v2  ;;  %v701_v6 = vsel %vm697_vm9, %v694_v1, 0.0  ;;  %1965 = vmatprep.mubr.msk.f32.mxu0 %vm942_vm4, %v817_v59 }
 0x106   : > { %728 = vrot.lane.b32.xlu0 %v710_v5, %s2420_s21  ;;  %vm705_vm12 = vcmp.ge.f32.partialorder %v701_v6, 0.0  ;;  %v709_v7 = vmul.f32 0.2, %v701_v6  ;;  %v700_v8 = vsel %vm697_vm9, %v693_v3, 0.0  ;;  %v822_v3 = vld [vmem:[%s2999_s8 + $0x8] sm:$0xff] }
 0x107   : > { %vm704_vm13 = vcmp.ge.f32.partialorder %v700_v8, 0.0  ;;  %v708_v9 = vmul.f32 0.2, %v700_v8 }
 0x108   : > { %v713_v10 = vsel %vm705_vm12, %v701_v6, %v709_v7  ;;  %v823_v6 = vld [vmem:[%s2999_s8 + $0x10] sm:$0xff] }
 0x109   : > { %734 = vrot.lane.b32.xlu1 %v713_v10, %s2420_s21  ;;  %v712_v11 = vsel %vm704_vm13, %v700_v8, %v708_v9 }
 0x10a   : > { %732 = vrot.lane.b32.xlu0 %v712_v11, %s2420_s21 }
 0x10d   : > { %752 = vrot.lane.b32.xlu1 %v711_v4, %s2421_s16 }
 0x10e   : > { %750 = vrot.lane.b32.xlu0 %v710_v5, %s2421_s16 }
 0x111   : > { %756 = vrot.lane.b32.xlu1 %v713_v10, %s2421_s16 }
 0x112   : > { %754 = vrot.lane.b32.xlu0 %v712_v11, %s2421_s16 }
 0x115   : > { %773 = vrot.lane.b32.xlu1 %v711_v4, %s2422_s22  ;;  %v821_v4 = vld [vmem:[%s2999_s8] sm:$0xff] }
 0x116   : > { %771 = vrot.lane.b32.xlu0 %v710_v5, %s2422_s22  ;;  %v824_v5 = vld [vmem:[%s2999_s8 + $0x18] sm:$0xff] }
 0x119   : > { %777 = vrot.lane.b32.xlu1 %v713_v10, %s2422_s22 }
 0x11a   : > { %775 = vrot.lane.b32.xlu0 %v712_v11, %s2422_s22 }
 0x177   : > { %v731_v12 = vpop.permute.xlu1 %730 }
 0x178   : > { %744 = vst.msk [vmem:[#allocation2 + $0x10] sm:$0xff] %vm740_vm14, %v731_v12  ;;  %v729_v13 = vpop.permute.xlu0 %728 }
 0x179   : > { %745 = vst.msk [vmem:[#allocation2 + $0x18] sm:$0xff] %vm742_vm15, %v731_v12  ;;  %743 = vst.msk [vmem:[#allocation2 + $0x8] sm:$0xff] %vm742_vm15, %v729_v13 }
 0x17a   : > { %741 = vst.msk [vmem:[#allocation2] sm:$0xff] %vm740_vm14, %v729_v13 }
 0x17b   : > { %v735_v14 = vpop.permute.xlu1 %734 }
 0x17c   : > { %748 = vst.msk [vmem:[#allocation2 + $0x30] sm:$0xff] %vm740_vm14, %v735_v14  ;;  %v733_v15 = vpop.permute.xlu0 %732 }
 0x17d   : > { %749 = vst.msk [vmem:[#allocation2 + $0x38] sm:$0xff] %vm742_vm15, %v735_v14  ;;  %747 = vst.msk [vmem:[#allocation2 + $0x28] sm:$0xff] %vm742_vm15, %v733_v15 }
 0x17e   : > { %746 = vst.msk [vmem:[#allocation2 + $0x20] sm:$0xff] %vm740_vm14, %v733_v15  ;;  %vm1080_vm14 = vcmask 1047648  }
 0x17f   : > { %v753_v16 = vpop.permute.xlu1 %752  ;;  %v795_v17 = vld [vmem:[#allocation2 + $0x10] sm:$0xff] }
 0x180   : > { %v796_v18 = vld [vmem:[#allocation2 + $0x18] sm:$0xff]  ;;  %765 = vst.msk [vmem:[#allocation2 + $0x50] sm:$0xff] %vm762_vm1, %v753_v16  ;;  %v751_v19 = vpop.permute.xlu0 %750  ;;  %v794_v22 = vld [vmem:[#allocation2 + $0x8] sm:$0xff] }
 0x181   : > { %766 = vst.msk [vmem:[#allocation2 + $0x58] sm:$0xff] %vm719_vm8, %v753_v16  ;;  %v2173_v20 = vpack.i.bf16 %v796_v18, %v795_v17  ;;  %v793_v21 = vld [vmem:[#allocation2] sm:$0xff]  ;;  %764 = vst.msk [vmem:[#allocation2 + $0x48] sm:$0xff] %vm719_vm8, %v751_v19 }
 0x182   : > { %1057 = vst.msk [vmem:[#allocation2 + $0x10] sm:$0xff] %vm714_vm7, %v2419_v29  ;;  %v2178_v23 = vpack.i.bf16 %v794_v22, %v793_v21  ;;  %1056 = vst.msk [vmem:[#allocation2] sm:$0xff] %vm714_vm7, %v2419_v29 }
 0x183   : > { %763 = vst.msk [vmem:[#allocation2 + $0x40] sm:$0xff] %vm762_vm1, %v751_v19  ;;  %2174 = vrot.lane.b32.xlu1 %v2173_v20, %s2423_s23  ;;  %v757_v24 = vpop.permute.xlu1 %756  ;;  %v799_v25 = vld [vmem:[#allocation2 + $0x30] sm:$0xff] }
 0x184   : > { %2179 = vrot.lane.b32.xlu0 %v2178_v23, %s2423_s23  ;;  %v800_v26 = vld [vmem:[#allocation2 + $0x38] sm:$0xff]  ;;  %769 = vst.msk [vmem:[#allocation2 + $0x70] sm:$0xff] %vm762_vm1, %v757_v24  ;;  %v755_v27 = vpop.permute.xlu0 %754  ;;  %v798_v31 = vld [vmem:[#allocation2 + $0x28] sm:$0xff] }
 0x185   : > { %770 = vst.msk [vmem:[#allocation2 + $0x78] sm:$0xff] %vm719_vm8, %v757_v24  ;;  %v2183_v28 = vpack.i.bf16 %v800_v26, %v799_v25  ;;  %v797_v30 = vld [vmem:[#allocation2 + $0x20] sm:$0xff]  ;;  %768 = vst.msk [vmem:[#allocation2 + $0x68] sm:$0xff] %vm719_vm8, %v755_v27 }
 0x186   : > { %1059 = vst.msk [vmem:[#allocation2 + $0x30] sm:$0xff] %vm714_vm7, %v2419_v29  ;;  %v2188_v32 = vpack.i.bf16 %v798_v31, %v797_v30  ;;  %1058 = vst.msk [vmem:[#allocation2 + $0x20] sm:$0xff] %vm714_vm7, %v2419_v29 }
 0x187   : > { %767 = vst.msk [vmem:[#allocation2 + $0x60] sm:$0xff] %vm762_vm1, %v755_v27  ;;  %2184 = vrot.lane.b32.xlu1 %v2183_v28, %s2423_s23  ;;  %v774_v33 = vpop.permute.xlu1 %773  ;;  %v803_v34 = vld [vmem:[#allocation2 + $0x50] sm:$0xff] }
 0x188   : > { %2189 = vrot.lane.b32.xlu0 %v2188_v32, %s2423_s23  ;;  %v804_v35 = vld [vmem:[#allocation2 + $0x58] sm:$0xff]  ;;  %787 = vst.msk [vmem:[#allocation2 + $0x90] sm:$0xff] %vm783_vm2, %v774_v33  ;;  %v772_v38 = vpop.permute.xlu0 %771  ;;  %v802_v43 = vld [vmem:[#allocation2 + $0x48] sm:$0xff] }
 0x189   : > { %788 = vst.msk [vmem:[#allocation2 + $0x98] sm:$0xff] %vm785_vm3, %v774_v33  ;;  %v2198_v40 = vpack.i.bf16 %v804_v35, %v803_v34  ;;  %786 = vst.msk [vmem:[#allocation2 + $0x88] sm:$0xff] %vm785_vm3, %v772_v38 }
 0x18a   : > { %v801_v41 = vld [vmem:[#allocation2 + $0x40] sm:$0xff]  ;;  %784 = vst.msk [vmem:[#allocation2 + $0x80] sm:$0xff] %vm783_vm2, %v772_v38 }
 0x18b   : > { %v2193_v45 = vpack.i.bf16 %v802_v43, %v801_v41  ;;  %2199 = vrot.lane.b32.xlu1 %v2198_v40, %s2423_s23  ;;  %v778_v46 = vpop.permute.xlu1 %777  ;;  %v807_v47 = vld [vmem:[#allocation2 + $0x70] sm:$0xff] }
 0x18c   : > { %v808_v48 = vld [vmem:[#allocation2 + $0x78] sm:$0xff]  ;;  %791 = vst.msk [vmem:[#allocation2 + $0xb0] sm:$0xff] %vm783_vm2, %v778_v46  ;;  %v776_v49 = vpop.permute.xlu0 %775  ;;  %v806_v52 = vld [vmem:[#allocation2 + $0x68] sm:$0xff] }
 0x18d   : > { %2194 = vrot.lane.b32.xlu0 %v2193_v45, %s2423_s23  ;;  %792 = vst.msk [vmem:[#allocation2 + $0xb8] sm:$0xff] %vm785_vm3, %v778_v46  ;;  %v2203_v50 = vpack.i.bf16 %v808_v48, %v807_v47  ;;  %790 = vst.msk [vmem:[#allocation2 + $0xa8] sm:$0xff] %vm785_vm3, %v776_v49  ;;  %vm1419_vm3 = vcmask 130048  }
 0x18e   : > { %v805_v51 = vld [vmem:[#allocation2 + $0x60] sm:$0xff]  ;;  %789 = vst.msk [vmem:[#allocation2 + $0xa0] sm:$0xff] %vm783_vm2, %v776_v49 }
 0x18f   : > { %v2208_v53 = vpack.i.bf16 %v806_v52, %v805_v51  ;;  %2204 = vrot.lane.b32.xlu1 %v2203_v50, %s2423_s23  ;;  %v811_v54 = vld [vmem:[#allocation2 + $0x90] sm:$0xff] }
 0x190   : > { %v812_v55 = vld [vmem:[#allocation2 + $0x98] sm:$0xff]  ;;  %v810_v58 = vld [vmem:[#allocation2 + $0x88] sm:$0xff] }
 0x191   : > { %2209 = vrot.lane.b32.xlu0 %v2208_v53, %s2423_s23  ;;  %v2218_v56 = vpack.i.bf16 %v812_v55, %v811_v54  ;;  %1061 = vst.msk [vmem:[#allocation2 + $0x98] sm:$0xff] %vm719_vm8, %v2419_v29  ;;  %v809_v57 = vld [vmem:[#allocation2 + $0x80] sm:$0xff]  ;;  %1060 = vst.msk [vmem:[#allocation2 + $0x88] sm:$0xff] %vm719_vm8, %v2419_v29 }
 0x192   : > { %v2213_v60 = vpack.i.bf16 %v810_v58, %v809_v57 }
 0x193   : > { %2219 = vrot.lane.b32.xlu1 %v2218_v56, %s2423_s23  ;;  %v815_v61 = vld [vmem:[#allocation2 + $0xb0] sm:$0xff] }
 0x194   : > { %v816_v62 = vld [vmem:[#allocation2 + $0xb8] sm:$0xff]  ;;  %v814_v1 = vld [vmem:[#allocation2 + $0xa8] sm:$0xff] }
 0x195   : > { %2214 = vrot.lane.b32.xlu0 %v2213_v60, %s2423_s23  ;;  %v2228_v63 = vpack.i.bf16 %v816_v62, %v815_v61  ;;  %1063 = vst.msk [vmem:[#allocation2 + $0xb8] sm:$0xff] %vm719_vm8, %v2419_v29  ;;  %v813_v0 = vld [vmem:[#allocation2 + $0xa0] sm:$0xff]  ;;  %1062 = vst.msk [vmem:[#allocation2 + $0xa8] sm:$0xff] %vm719_vm8, %v2419_v29 }
 0x196   : > { %v2223_v2 = vpack.i.bf16 %v814_v1, %v813_v0 }
 0x197   : > { %2229 = vrot.lane.b32.xlu1 %v2228_v63, %s2423_s23 }
 0x199   : > { %2224 = vrot.lane.b32.xlu0 %v2223_v2, %s2423_s23 }
 0x19b   : > { %832 = vperm.xlu1 %2172, %v822_v3   ;;  %v818_v3 = vld [vmem:[%s2998_s7 + $0x8] sm:$0xff] }
 0x19d   : > { %827 = vperm.xlu0 %2171, %v821_v4   ;;  %v819_v4 = vld [vmem:[%s2998_s7 + $0x10] sm:$0xff] }
 0x19f   : > { %842 = vperm.xlu1 %2172, %v824_v5   ;;  %v820_v5 = vld [vmem:[%s2998_s7 + $0x18] sm:$0xff] }
 0x1a1   : > { %837 = vperm.xlu0 %2171, %v823_v6  }
 0x1f5   : > { %v2175_v7 = vpop.permute.xlu1 %2174 }
 0x1f6   : > { %v2177_v8 = vunpack.i.h.bf16 %v2175_v7  ;;  %v2176_v9 = vunpack.i.l.bf16 %v2175_v7  ;;  %v2180_v10 = vpop.permute.xlu0 %2179 }
 0x1f7   : > { %v2182_v11 = vunpack.i.h.bf16 %v2180_v10  ;;  %v2181_v12 = vunpack.i.l.bf16 %v2180_v10 }
 0x1f8   : > { %v919_v13 = vsel %vm917_vm5, %v2176_v9, %v2177_v8 }
 0x1f9   : > { %v2185_v14 = vpop.permute.xlu1 %2184  ;;  %v918_v15 = vsel %vm917_vm5, %v2181_v12, %v2182_v11 }
 0x1fa   : > { %v2187_v16 = vunpack.i.h.bf16 %v2185_v14  ;;  %v2186_v17 = vunpack.i.l.bf16 %v2185_v14  ;;  %v2190_v18 = vpop.permute.xlu0 %2189  ;;  %v2037_v19 = vpack.c.bf16 %v919_v13, %v918_v15 }
 0x1fb   : > { %v2192_v20 = vunpack.i.h.bf16 %v2190_v18  ;;  %v2191_v21 = vunpack.i.l.bf16 %v2190_v18 }
 0x1fc   : > { %2038 = vmatprep.subr.bf16.mxu0 %v2037_v19  ;;  %v921_v22 = vsel %vm917_vm5, %v2186_v17, %v2187_v16 }
 0x1fd   : > { %v2200_v23 = vpop.permute.xlu1 %2199  ;;  %2040 = vmatpush3.bf16.msra.mxu0 %v2037_v19  ;;  %v920_v24 = vsel %vm917_vm5, %v2191_v21, %v2192_v20 }
 0x1fe   : > { %v2202_v25 = vunpack.i.h.bf16 %v2200_v23  ;;  %v2201_v26 = vunpack.i.l.bf16 %v2200_v23  ;;  %v2041_v28 = vpack.c.bf16 %v921_v22, %v920_v24 }
 0x1ff   : > { %v2195_v27 = vpop.permute.xlu0 %2194 }
 0x200   : > { %v2197_v30 = vunpack.i.h.bf16 %v2195_v27  ;;  %v2196_v31 = vunpack.i.l.bf16 %v2195_v27  ;;  %2042 = vmatprep.subr.bf16.mxu0 %v2041_v28  ;;  %v923_v32 = vsel %vm917_vm5, %v2201_v26, %v2202_v25 }
 0x201   : > { %v2205_v33 = vpop.permute.xlu1 %2204  ;;  %2044 = vmatpush3.bf16.msra.mxu0 %v2041_v28 }
 0x202   : > { %v922_v34 = vsel %vm917_vm5, %v2196_v31, %v2197_v30  ;;  %v2207_v35 = vunpack.i.h.bf16 %v2205_v33  ;;  %v2206_v38 = vunpack.i.l.bf16 %v2205_v33 }
 0x203   : > { %v2210_v40 = vpop.permute.xlu0 %2209  ;;  %v2045_v41 = vpack.c.bf16 %v923_v32, %v922_v34 }
 0x204   : > { %v2212_v43 = vunpack.i.h.bf16 %v2210_v40  ;;  %v2211_v45 = vunpack.i.l.bf16 %v2210_v40  ;;  %v925_v46 = vsel %vm917_vm5, %v2206_v38, %v2207_v35 }
 0x205   : > { %2046 = vmatprep.subr.bf16.mxu0 %v2045_v41  ;;  %v2220_v47 = vpop.permute.xlu1 %2219 }
 0x206   : > { %2048 = vmatpush3.bf16.msra.mxu0 %v2045_v41  ;;  %v924_v48 = vsel %vm917_vm5, %v2211_v45, %v2212_v43  ;;  %v2222_v49 = vunpack.i.h.bf16 %v2220_v47  ;;  %v2221_v50 = vunpack.i.l.bf16 %v2220_v47 }
 0x207   : > { %v2215_v51 = vpop.permute.xlu0 %2214  ;;  %v2049_v52 = vpack.c.bf16 %v925_v46, %v924_v48 }
 0x208   : > { %v2217_v53 = vunpack.i.h.bf16 %v2215_v51  ;;  %v2216_v54 = vunpack.i.l.bf16 %v2215_v51  ;;  %v927_v55 = vsel %vm917_vm5, %v2221_v50, %v2222_v49 }
 0x209   : > { %2050 = vmatprep.subr.bf16.mxu0 %v2049_v52  ;;  %v2230_v56 = vpop.permute.xlu1 %2229 }
 0x20a   : > { %2052 = vmatpush3.bf16.msra.mxu0 %v2049_v52  ;;  %v926_v57 = vsel %vm917_vm5, %v2216_v54, %v2217_v53  ;;  %v2232_v58 = vunpack.i.h.bf16 %v2230_v56  ;;  %v2231_v59 = vunpack.i.l.bf16 %v2230_v56 }
 0x20b   : > { %v2225_v60 = vpop.permute.xlu0 %2224  ;;  %v2053_v61 = vpack.c.bf16 %v927_v55, %v926_v57 }
 0x20c   : > { %v2227_v62 = vunpack.i.h.bf16 %v2225_v60  ;;  %v2226_v63 = vunpack.i.l.bf16 %v2225_v60  ;;  %v929_v0 = vsel %vm917_vm5, %v2231_v59, %v2232_v58 }
 0x20d   : > { %2054 = vmatprep.subr.bf16.mxu0 %v2053_v61 }
 0x20e   : > { %2056 = vmatpush3.bf16.msra.mxu0 %v2053_v61  ;;  %v928_v1 = vsel %vm917_vm5, %v2226_v63, %v2227_v62 }
 0x20f   : > { %v2057_v2 = vpack.c.bf16 %v929_v0, %v928_v1 }
 0x211   : > { %2058 = vmatprep.subr.bf16.mxu0 %v2057_v2 }
 0x212   : > { %2060 = vmatpush3.bf16.msra.mxu0 %v2057_v2 }
 0x215   : > { %1966 = vmatmul.mubr.msk.f32.vlgmr.msra.gmra.mrb[0].mxu0 %vm942_vm4, %v818_v3 }
 0x216   : > { %1968 = vmatprep.mubr.msk.f32.mxu0 %vm942_vm4, %v819_v4 }
 0x219   : > { %1969 = vmatmul.mubr.msk.f32.gmra.mrb[2].mxu0 %vm942_vm4, %v820_v5 }
 0x21a   : > { %v833_v6 = vpop.permute.xlu1 %832 }
 0x21c   : > { %v828_v7 = vpop.permute.xlu0 %827 }
 0x21e   : > { %v843_v13 = vpop.permute.xlu1 %842 }
 0x220   : > { %v838_v17 = vpop.permute.xlu0 %837 }
 0x2e8   : > { %v1967_v8 = vpop.f32.mrb[0].mxu0 }
 0x2e9   : > { %v1027_v9 = vadd.f32 %v1967_v8, %v833_v6  ;;  %v1021_v10 = vpop.f32.mrb[1].mxu0 }
 0x2ea   : > { %v1022_v11 = vadd.f32 %v1021_v10, %v828_v7 }
 0x2eb   : > { %v1041_v12 = vsel %vm697_vm9, %v1027_v9, 0.0 }
 0x2ec   : > { %v1049_v14 = vmul.f32 0.2, %v1041_v12  ;;  %v1040_v15 = vsel %vm697_vm9, %v1022_v11, 0.0  ;;  %v1970_v16 = vpop.f32.mrb[2].mxu0  ;;  %vm1045_vm10 = vcmp.ge.f32.partialorder %v1041_v12, 0.0 }
 0x2ed   : > { %v1048_v18 = vmul.f32 0.2, %v1040_v15  ;;  %v1037_v19 = vadd.f32 %v1970_v16, %v843_v13  ;;  %v1031_v20 = vpop.f32.mrb[3].mxu0  ;;  %vm1044_vm11 = vcmp.ge.f32.partialorder %v1040_v15, 0.0  ;;  %v1831_v13 = vld [vmem:[%s2998_s7 + $0x20] sm:$0xff] }
 0x2ee   : > { %v1032_v21 = vadd.f32 %v1031_v20, %v838_v17  ;;  %v1053_v22 = vsel %vm1045_vm10, %v1041_v12, %v1049_v14  ;;  %1995 = vmatprep.mubr.msk.f32.mxu1 %vm942_vm4, %v1831_v13 }
 0x2ef   : > { %v1043_v23 = vsel %vm697_vm9, %v1037_v19, 0.0  ;;  %1070 = vrot.lane.b32.xlu1 %v1053_v22, %s2424_s28  ;;  %v1052_v24 = vsel %vm1044_vm11, %v1040_v15, %v1048_v18 }
 0x2f0   : > { %v1051_v25 = vmul.f32 0.2, %v1043_v23  ;;  %v1042_v26 = vsel %vm697_vm9, %v1032_v21, 0.0  ;;  %1068 = vrot.lane.b32.xlu0 %v1052_v24, %s2424_s28  ;;  %vm1047_vm12 = vcmp.ge.f32.partialorder %v1043_v23, 0.0  ;;  %v1836_v21 = vld [vmem:[%s2999_s8 + $0x28] sm:$0xff] }
 0x2f1   : > { %v1050_v27 = vmul.f32 0.2, %v1042_v26  ;;  %vm1046_vm13 = vcmp.ge.f32.partialorder %v1042_v26, 0.0 }
 0x2f2   : > { %v1055_v28 = vsel %vm1047_vm12, %v1043_v23, %v1051_v25  ;;  %v1838_v23 = vld [vmem:[%s2999_s8 + $0x38] sm:$0xff] }
 0x2f3   : > { %1074 = vrot.lane.b32.xlu1 %v1055_v28, %s2424_s28  ;;  %v1054_v30 = vsel %vm1046_vm13, %v1042_v26, %v1050_v27 }
 0x2f4   : > { %1072 = vrot.lane.b32.xlu0 %v1054_v30, %s2424_s28  ;;  %s1720_s28 = sshll.u32 %s355_s26, 4  ;;  %s2940_s28 = int_to_ptr.vmem [resolvable:$true] %s1720_s28 }
 0x2f5   : > { %s2353_s22 = scalar_lea.vmem %s2940_s28, 512 }
 0x2f6   : > { %p2354_p11 = scmp.ne.s32.totalorder %s2940_s28, %s2353_s22 }
 0x2f7   : > { %1091 = vrot.lane.b32.xlu1 %v1053_v22, %s2421_s16 }
 0x2f8   : > { %1089 = vrot.lane.b32.xlu0 %v1052_v24, %s2421_s16  ;;  %p2355_p12 = pnand %p2354_p11, %p2517_p5 }
 0x2fa   : > { %p2356_p13 = pneg %p2355_p12 }
 0x2fb   : > { %1095 = vrot.lane.b32.xlu1 %v1055_v28, %s2421_s16 }
 0x2fc   : > { %1093 = vrot.lane.b32.xlu0 %v1054_v30, %s2421_s16 }
 0x2ff   : > { %1111 = vrot.lane.b32.xlu1 %v1053_v22, %s2425_s29  ;;  %v1835_v22 = vld [vmem:[%s2999_s8 + $0x20] sm:$0xff] }
 0x300   : > { %1109 = vrot.lane.b32.xlu0 %v1052_v24, %s2425_s29 }
 0x303   : > { %1115 = vrot.lane.b32.xlu1 %v1055_v28, %s2425_s29 }
 0x304   : > { %1113 = vrot.lane.b32.xlu0 %v1054_v30, %s2425_s29  ;;  %s1863_s29 = sshll.u32 %s2500_s13, 9  ;;  %s2949_s13 = scalar_lea.sflag [#allocation4], %s353_s18 }
 0x305   : > { %s2945_s21 = scalar_lea.hbm %s3000_s9, %s1863_s29 }
 0x361   : > { %v1071_v31 = vpop.permute.xlu1 %1070 }
 0x362   : > { %1083 = vst.msk [vmem:[#allocation2 + $0x10] sm:$0xff] %vm1080_vm14, %v1071_v31  ;;  %v1069_v32 = vpop.permute.xlu0 %1068 }
 0x363   : > { %1084 = vst.msk [vmem:[#allocation2 + $0x18] sm:$0xff] %vm538_vm6, %v1071_v31  ;;  %1082 = vst.msk [vmem:[#allocation2 + $0x8] sm:$0xff] %vm538_vm6, %v1069_v32 }
 0x364   : > { %1081 = vst.msk [vmem:[#allocation2] sm:$0xff] %vm1080_vm14, %v1069_v32 }
 0x365   : > { %v1075_v33 = vpop.permute.xlu1 %1074 }
 0x366   : > { %1087 = vst.msk [vmem:[#allocation2 + $0x30] sm:$0xff] %vm1080_vm14, %v1075_v33  ;;  %v1073_v34 = vpop.permute.xlu0 %1072 }
 0x367   : > { %1088 = vst.msk [vmem:[#allocation2 + $0x38] sm:$0xff] %vm538_vm6, %v1075_v33  ;;  %1086 = vst.msk [vmem:[#allocation2 + $0x28] sm:$0xff] %vm538_vm6, %v1073_v34  ;;  %vm1121_vm6 = vcmask 1047584  }
 0x368   : > { %1085 = vst.msk [vmem:[#allocation2 + $0x20] sm:$0xff] %vm1080_vm14, %v1073_v34 }
 0x369   : > { %v1092_v35 = vpop.permute.xlu1 %1091  ;;  %v1132_v38 = vld [vmem:[#allocation2 + $0x10] sm:$0xff] }
 0x36a   : > { %v1133_v40 = vld [vmem:[#allocation2 + $0x18] sm:$0xff]  ;;  %1103 = vst.msk [vmem:[#allocation2 + $0x50] sm:$0xff] %vm762_vm1, %v1092_v35  ;;  %v1090_v41 = vpop.permute.xlu0 %1089  ;;  %v1131_v46 = vld [vmem:[#allocation2 + $0x8] sm:$0xff] }
 0x36b   : > { %1104 = vst.msk [vmem:[#allocation2 + $0x58] sm:$0xff] %vm719_vm8, %v1092_v35  ;;  %v2233_v43 = vpack.i.bf16 %v1133_v40, %v1132_v38  ;;  %v1130_v45 = vld [vmem:[#allocation2] sm:$0xff]  ;;  %1102 = vst.msk [vmem:[#allocation2 + $0x48] sm:$0xff] %vm719_vm8, %v1090_v41 }
 0x36c   : > { %1394 = vst.msk [vmem:[#allocation2 + $0x10] sm:$0xff] %vm714_vm7, %v2419_v29  ;;  %v2238_v47 = vpack.i.bf16 %v1131_v46, %v1130_v45  ;;  %1393 = vst.msk [vmem:[#allocation2] sm:$0xff] %vm714_vm7, %v2419_v29 }
 0x36d   : > { %1101 = vst.msk [vmem:[#allocation2 + $0x40] sm:$0xff] %vm762_vm1, %v1090_v41  ;;  %2234 = vrot.lane.b32.xlu1 %v2233_v43, %s2423_s23  ;;  %v1096_v48 = vpop.permute.xlu1 %1095  ;;  %v1136_v49 = vld [vmem:[#allocation2 + $0x30] sm:$0xff] }
 0x36e   : > { %2239 = vrot.lane.b32.xlu0 %v2238_v47, %s2423_s23  ;;  %v1137_v50 = vld [vmem:[#allocation2 + $0x38] sm:$0xff]  ;;  %1107 = vst.msk [vmem:[#allocation2 + $0x70] sm:$0xff] %vm762_vm1, %v1096_v48  ;;  %v1094_v51 = vpop.permute.xlu0 %1093  ;;  %v1135_v54 = vld [vmem:[#allocation2 + $0x28] sm:$0xff] }
 0x36f   : > { %1108 = vst.msk [vmem:[#allocation2 + $0x78] sm:$0xff] %vm719_vm8, %v1096_v48  ;;  %v2243_v52 = vpack.i.bf16 %v1137_v50, %v1136_v49  ;;  %v1134_v53 = vld [vmem:[#allocation2 + $0x20] sm:$0xff]  ;;  %1106 = vst.msk [vmem:[#allocation2 + $0x68] sm:$0xff] %vm719_vm8, %v1094_v51 }
 0x370   : > { %1396 = vst.msk [vmem:[#allocation2 + $0x30] sm:$0xff] %vm714_vm7, %v2419_v29  ;;  %v2248_v55 = vpack.i.bf16 %v1135_v54, %v1134_v53  ;;  %1395 = vst.msk [vmem:[#allocation2 + $0x20] sm:$0xff] %vm714_vm7, %v2419_v29 }
 0x371   : > { %1105 = vst.msk [vmem:[#allocation2 + $0x60] sm:$0xff] %vm762_vm1, %v1094_v51  ;;  %2244 = vrot.lane.b32.xlu1 %v2243_v52, %s2423_s23  ;;  %v1112_v56 = vpop.permute.xlu1 %1111  ;;  %v1140_v57 = vld [vmem:[#allocation2 + $0x50] sm:$0xff] }
 0x372   : > { %2249 = vrot.lane.b32.xlu0 %v2248_v55, %s2423_s23  ;;  %v1141_v58 = vld [vmem:[#allocation2 + $0x58] sm:$0xff]  ;;  %1124 = vst.msk [vmem:[#allocation2 + $0x90] sm:$0xff] %vm1121_vm6, %v1112_v56  ;;  %v1110_v59 = vpop.permute.xlu0 %1109  ;;  %v1139_v62 = vld [vmem:[#allocation2 + $0x48] sm:$0xff] }
 0x373   : > { %1125 = vst.msk [vmem:[#allocation2 + $0x98] sm:$0xff] %vm403_vm0, %v1112_v56  ;;  %v2258_v60 = vpack.i.bf16 %v1141_v58, %v1140_v57  ;;  %1123 = vst.msk [vmem:[#allocation2 + $0x88] sm:$0xff] %vm403_vm0, %v1110_v59 }
 0x374   : > { %v1138_v61 = vld [vmem:[#allocation2 + $0x40] sm:$0xff]  ;;  %1122 = vst.msk [vmem:[#allocation2 + $0x80] sm:$0xff] %vm1121_vm6, %v1110_v59 }
 0x375   : > { %v2253_v63 = vpack.i.bf16 %v1139_v62, %v1138_v61  ;;  %2259 = vrot.lane.b32.xlu1 %v2258_v60, %s2423_s23  ;;  %v1116_v0 = vpop.permute.xlu1 %1115  ;;  %v1144_v1 = vld [vmem:[#allocation2 + $0x70] sm:$0xff] }
 0x376   : > { %v1145_v2 = vld [vmem:[#allocation2 + $0x78] sm:$0xff]  ;;  %1128 = vst.msk [vmem:[#allocation2 + $0xb0] sm:$0xff] %vm1121_vm6, %v1116_v0  ;;  %v1114_v3 = vpop.permute.xlu0 %1113  ;;  %v1143_v6 = vld [vmem:[#allocation2 + $0x68] sm:$0xff] }
 0x377   : > { %2254 = vrot.lane.b32.xlu0 %v2253_v63, %s2423_s23  ;;  %1129 = vst.msk [vmem:[#allocation2 + $0xb8] sm:$0xff] %vm403_vm0, %v1116_v0  ;;  %v2263_v4 = vpack.i.bf16 %v1145_v2, %v1144_v1  ;;  %1127 = vst.msk [vmem:[#allocation2 + $0xa8] sm:$0xff] %vm403_vm0, %v1114_v3 }
 0x378   : > { %v1142_v5 = vld [vmem:[#allocation2 + $0x60] sm:$0xff]  ;;  %1126 = vst.msk [vmem:[#allocation2 + $0xa0] sm:$0xff] %vm1121_vm6, %v1114_v3 }
 0x379   : > { %v2268_v7 = vpack.i.bf16 %v1143_v6, %v1142_v5  ;;  %2264 = vrot.lane.b32.xlu1 %v2263_v4, %s2423_s23  ;;  %v1148_v8 = vld [vmem:[#allocation2 + $0x90] sm:$0xff] }
 0x37a   : > { %v1149_v9 = vld [vmem:[#allocation2 + $0x98] sm:$0xff]  ;;  %v1147_v12 = vld [vmem:[#allocation2 + $0x88] sm:$0xff] }
 0x37b   : > { %2269 = vrot.lane.b32.xlu0 %v2268_v7, %s2423_s23  ;;  %1398 = vst.msk [vmem:[#allocation2 + $0x98] sm:$0xff] %vm719_vm8, %v2419_v29  ;;  %v2278_v10 = vpack.i.bf16 %v1149_v9, %v1148_v8  ;;  %v1146_v11 = vld [vmem:[#allocation2 + $0x80] sm:$0xff]  ;;  %1397 = vst.msk [vmem:[#allocation2 + $0x88] sm:$0xff] %vm719_vm8, %v2419_v29 }
 0x37c   : > { %v2273_v14 = vpack.i.bf16 %v1147_v12, %v1146_v11 }
 0x37d   : > { %2279 = vrot.lane.b32.xlu1 %v2278_v10, %s2423_s23  ;;  %v1152_v15 = vld [vmem:[#allocation2 + $0xb0] sm:$0xff] }
 0x37e   : > { %v1153_v16 = vld [vmem:[#allocation2 + $0xb8] sm:$0xff]  ;;  %v1151_v19 = vld [vmem:[#allocation2 + $0xa8] sm:$0xff] }
 0x37f   : > { %2274 = vrot.lane.b32.xlu0 %v2273_v14, %s2423_s23  ;;  %1400 = vst.msk [vmem:[#allocation2 + $0xb8] sm:$0xff] %vm719_vm8, %v2419_v29  ;;  %v2288_v17 = vpack.i.bf16 %v1153_v16, %v1152_v15  ;;  %v1150_v18 = vld [vmem:[#allocation2 + $0xa0] sm:$0xff]  ;;  %1399 = vst.msk [vmem:[#allocation2 + $0xa8] sm:$0xff] %vm719_vm8, %v2419_v29  ;;  %v1837_v29 = vld [vmem:[%s2999_s8 + $0x30] sm:$0xff] }
 0x380   : > { %v2283_v20 = vpack.i.bf16 %v1151_v19, %v1150_v18 }
 0x381   : > { %2289 = vrot.lane.b32.xlu1 %v2288_v17, %s2423_s23 }
 0x383   : > { %2284 = vrot.lane.b32.xlu0 %v2283_v20, %s2423_s23  ;;  %v1832_v20 = vld [vmem:[%s2998_s7 + $0x28] sm:$0xff] }
 0x385   : > { %1171 = vperm.xlu1 %2172, %v1836_v21   ;;  %v1833_v21 = vld [vmem:[%s2998_s7 + $0x30] sm:$0xff] }
 0x387   : > { %1166 = vperm.xlu0 %2171, %v1835_v22   ;;  %v1834_v22 = vld [vmem:[%s2998_s7 + $0x38] sm:$0xff] }
 0x389   : > { %1181 = vperm.xlu1 %2172, %v1838_v23  }
 0x38b   : > { %1176 = vperm.xlu0 %2171, %v1837_v29  }
 0x3df   : > { %v2235_v24 = vpop.permute.xlu1 %2234 }
 0x3e0   : > { %v2237_v25 = vunpack.i.h.bf16 %v2235_v24  ;;  %v2236_v26 = vunpack.i.l.bf16 %v2235_v24  ;;  %v2240_v27 = vpop.permute.xlu0 %2239 }
 0x3e1   : > { %v2242_v28 = vunpack.i.h.bf16 %v2240_v27  ;;  %v2241_v30 = vunpack.i.l.bf16 %v2240_v27 }
 0x3e2   : > { %v1257_v31 = vsel %vm917_vm5, %v2236_v26, %v2237_v25 }
 0x3e3   : > { %v2245_v32 = vpop.permute.xlu1 %2244  ;;  %v1256_v33 = vsel %vm917_vm5, %v2241_v30, %v2242_v28 }
 0x3e4   : > { %v2247_v34 = vunpack.i.h.bf16 %v2245_v32  ;;  %v2246_v35 = vunpack.i.l.bf16 %v2245_v32  ;;  %v2250_v38 = vpop.permute.xlu0 %2249  ;;  %v2061_v40 = vpack.c.bf16 %v1257_v31, %v1256_v33 }
 0x3e5   : > { %v2252_v41 = vunpack.i.h.bf16 %v2250_v38  ;;  %v2251_v43 = vunpack.i.l.bf16 %v2250_v38 }
 0x3e6   : > { %2062 = vmatprep.subr.bf16.mxu1 %v2061_v40  ;;  %v1259_v45 = vsel %vm917_vm5, %v2246_v35, %v2247_v34 }
 0x3e7   : > { %v2260_v46 = vpop.permute.xlu1 %2259  ;;  %2064 = vmatpush3.bf16.msra.mxu1 %v2061_v40  ;;  %v1258_v47 = vsel %vm917_vm5, %v2251_v43, %v2252_v41 }
 0x3e8   : > { %v2262_v48 = vunpack.i.h.bf16 %v2260_v46  ;;  %v2261_v49 = vunpack.i.l.bf16 %v2260_v46  ;;  %v2065_v51 = vpack.c.bf16 %v1259_v45, %v1258_v47 }
 0x3e9   : > { %v2255_v50 = vpop.permute.xlu0 %2254 }
 0x3ea   : > { %v2257_v52 = vunpack.i.h.bf16 %v2255_v50  ;;  %v2256_v53 = vunpack.i.l.bf16 %v2255_v50  ;;  %2066 = vmatprep.subr.bf16.mxu1 %v2065_v51  ;;  %v1261_v54 = vsel %vm917_vm5, %v2261_v49, %v2262_v48 }
 0x3eb   : > { %v2265_v55 = vpop.permute.xlu1 %2264  ;;  %2068 = vmatpush3.bf16.msra.mxu1 %v2065_v51 }
 0x3ec   : > { %v1260_v56 = vsel %vm917_vm5, %v2256_v53, %v2257_v52  ;;  %v2267_v57 = vunpack.i.h.bf16 %v2265_v55  ;;  %v2266_v58 = vunpack.i.l.bf16 %v2265_v55 }
 0x3ed   : > { %v2270_v59 = vpop.permute.xlu0 %2269  ;;  %v2069_v60 = vpack.c.bf16 %v1261_v54, %v1260_v56 }
 0x3ee   : > { %v2272_v61 = vunpack.i.h.bf16 %v2270_v59  ;;  %v2271_v62 = vunpack.i.l.bf16 %v2270_v59  ;;  %v1263_v63 = vsel %vm917_vm5, %v2266_v58, %v2267_v57 }
 0x3ef   : > { %2070 = vmatprep.subr.bf16.mxu1 %v2069_v60  ;;  %v2280_v0 = vpop.permute.xlu1 %2279 }
 0x3f0   : > { %2072 = vmatpush3.bf16.msra.mxu1 %v2069_v60  ;;  %v1262_v1 = vsel %vm917_vm5, %v2271_v62, %v2272_v61  ;;  %v2282_v2 = vunpack.i.h.bf16 %v2280_v0  ;;  %v2281_v3 = vunpack.i.l.bf16 %v2280_v0 }
 0x3f1   : > { %v2275_v4 = vpop.permute.xlu0 %2274  ;;  %v2073_v5 = vpack.c.bf16 %v1263_v63, %v1262_v1 }
 0x3f2   : > { %v2277_v6 = vunpack.i.h.bf16 %v2275_v4  ;;  %v2276_v7 = vunpack.i.l.bf16 %v2275_v4  ;;  %v1265_v8 = vsel %vm917_vm5, %v2281_v3, %v2282_v2 }
 0x3f3   : > { %2074 = vmatprep.subr.bf16.mxu1 %v2073_v5  ;;  %v2290_v9 = vpop.permute.xlu1 %2289 }
 0x3f4   : > { %2076 = vmatpush3.bf16.msra.mxu1 %v2073_v5  ;;  %v1264_v10 = vsel %vm917_vm5, %v2276_v7, %v2277_v6  ;;  %v2292_v11 = vunpack.i.h.bf16 %v2290_v9  ;;  %v2291_v12 = vunpack.i.l.bf16 %v2290_v9 }
 0x3f5   : > { %v2285_v13 = vpop.permute.xlu0 %2284  ;;  %v2077_v14 = vpack.c.bf16 %v1265_v8, %v1264_v10 }
 0x3f6   : > { %v2287_v15 = vunpack.i.h.bf16 %v2285_v13  ;;  %v2286_v16 = vunpack.i.l.bf16 %v2285_v13  ;;  %v1267_v17 = vsel %vm917_vm5, %v2291_v12, %v2292_v11 }
 0x3f7   : > { %2078 = vmatprep.subr.bf16.mxu1 %v2077_v14 }
 0x3f8   : > { %2080 = vmatpush3.bf16.msra.mxu1 %v2077_v14  ;;  %v1266_v18 = vsel %vm917_vm5, %v2286_v16, %v2287_v15 }
 0x3f9   : > { %v2081_v19 = vpack.c.bf16 %v1267_v17, %v1266_v18 }
 0x3fb   : > { %2082 = vmatprep.subr.bf16.mxu1 %v2081_v19 }
 0x3fc   : > { %2084 = vmatpush3.bf16.msra.mxu1 %v2081_v19  ;;  %v1470_v19 = vld [vmem:[#allocation2 + $0x98] sm:$0xff] }
 0x3ff   : > { %1996 = vmatmul.mubr.msk.f32.vlgmr.msra.gmra.mrb[8].mxu1 %vm942_vm4, %v1832_v20  ;;  %v1468_v20 = vld [vmem:[#allocation2 + $0x88] sm:$0xff] }
 0x400   : > { %1998 = vmatprep.mubr.msk.f32.mxu1 %vm942_vm4, %v1833_v21 }
 0x403   : > { %1999 = vmatmul.mubr.msk.f32.gmra.mrb[10].mxu1 %vm942_vm4, %v1834_v22  ;;  %v1843_v22 = vld [vmem:[%s2998_s7 + $0x40] sm:$0xff] }
 0x404   : > { %v1172_v23 = vpop.permute.xlu1 %1171  ;;  %2025 = vmatprep.mubr.msk.f32.mxu0 %vm942_vm4, %v1843_v22 }
 0x406   : > { %v1167_v29 = vpop.permute.xlu0 %1166 }
 0x408   : > { %v1182_v30 = vpop.permute.xlu1 %1181 }
 0x40a   : > { %v1177_v34 = vpop.permute.xlu0 %1176 }
 0x4d2   : > { %v1997_v24 = vpop.f32.mrb[8].mxu1 }
 0x4d3   : > { %v1364_v25 = vadd.f32 %v1997_v24, %v1172_v23  ;;  %v1358_v26 = vpop.f32.mrb[9].mxu1  ;;  %v1472_v24 = vld [vmem:[#allocation2 + $0xa8] sm:$0xff] }
 0x4d4   : > { %v1359_v27 = vadd.f32 %v1358_v26, %v1167_v29  ;;  %v1474_v29 = vld [vmem:[#allocation2 + $0xb8] sm:$0xff] }
 0x4d5   : > { %v1378_v28 = vsel %vm697_vm9, %v1364_v25, 0.0 }
 0x4d6   : > { %v1386_v31 = vmul.f32 0.2, %v1378_v28  ;;  %v1377_v32 = vsel %vm697_vm9, %v1359_v27, 0.0  ;;  %v2000_v33 = vpop.f32.mrb[10].mxu1  ;;  %vm1382_vm0 = vcmp.ge.f32.partialorder %v1378_v28, 0.0  ;;  %v378_v27 = vld [vmem:[%s2995_s4 + $0x8] sm:$0xff] }
 0x4d7   : > { %v1385_v35 = vmul.f32 0.2, %v1377_v32  ;;  %v1374_v38 = vadd.f32 %v2000_v33, %v1182_v30  ;;  %v1368_v40 = vpop.f32.mrb[11].mxu1  ;;  %vm1381_vm7 = vcmp.ge.f32.partialorder %v1377_v32, 0.0  ;;  %v380_v30 = vld [vmem:[%s2995_s4 + $0x18] sm:$0xff]  ;;  %v1847_v33 = vld [vmem:[%s2999_s8 + $0x40] sm:$0xff] }
 0x4d8   : > { %v1369_v41 = vadd.f32 %v1368_v40, %v1177_v34  ;;  %v2828_v43 = vsel %vm1382_vm0, %v1378_v28, %v1386_v31  ;;  %v377_v28 = vld [vmem:[%s2995_s4] sm:$0xff]  ;;  %v379_v31 = vld [vmem:[%s2995_s4 + $0x10] sm:$0xff]  ;;  %v1850_v34 = vld [vmem:[%s2999_s8 + $0x58] sm:$0xff] }
 0x4d9   : > { %v1380_v45 = vsel %vm697_vm9, %v1374_v38, 0.0  ;;  %1407 = vrot.lane.b32.xlu1 %v2828_v43, %s2426_s27  ;;  %1448 = vst [vmem:[#allocation2 + $0x90] sm:$0xff] %v2828_v43  ;;  %v2834_v46 = vsel %vm1381_vm7, %v1377_v32, %v1385_v35  ;;  %v2338_v21 = vpack.i.bf16 %v1470_v19, %v2828_v43  ;;  %v1848_v32 = vld [vmem:[%s2999_s8 + $0x48] sm:$0xff]  ;;  %v1849_v35 = vld [vmem:[%s2999_s8 + $0x50] sm:$0xff] }
 0x4da   : > { %v1388_v47 = vmul.f32 0.2, %v1380_v45  ;;  %v1379_v48 = vsel %vm697_vm9, %v1369_v41, 0.0  ;;  %1405 = vrot.lane.b32.xlu0 %v2834_v46, %s2426_s27  ;;  %1447 = vst [vmem:[#allocation2 + $0x80] sm:$0xff] %v2834_v46  ;;  %vm1384_vm15 = vcmp.ge.f32.partialorder %v1380_v45, 0.0  ;;  %vm1417_vm9 = vcmask 1047680  }
 0x4db   : > { %v1387_v49 = vmul.f32 0.2, %v1379_v48  ;;  %vm1383_vm2 = vcmp.ge.f32.partialorder %v1379_v48, 0.0  ;;  %v2333_v23 = vpack.i.bf16 %v1468_v20, %v2834_v46 }
 0x4dc   : > { %v2840_v50 = vsel %vm1384_vm15, %v1380_v45, %v1388_v47 }
 0x4dd   : > { %1411 = vrot.lane.b32.xlu1 %v2840_v50, %s2426_s27  ;;  %1450 = vst [vmem:[#allocation2 + $0xb0] sm:$0xff] %v2840_v50  ;;  %v2844_v51 = vsel %vm1383_vm2, %v1379_v48, %v1387_v49  ;;  %v2348_v25 = vpack.i.bf16 %v1474_v29, %v2840_v50 }
 0x4de   : > { %1449 = vst [vmem:[#allocation2 + $0xa0] sm:$0xff] %v2844_v51  ;;  %1409 = vrot.lane.b32.xlu0 %v2844_v51, %s2426_s27  ;;  %v2343_v26 = vpack.i.bf16 %v1472_v24, %v2844_v51 }
 0x4e1   : > { %1429 = vrot.lane.b32.xlu1 %v2828_v43, %s2421_s16 }
 0x4e2   : > { %1427 = vrot.lane.b32.xlu0 %v2834_v46, %s2421_s16 }
 0x4e5   : > { %1433 = vrot.lane.b32.xlu1 %v2840_v50, %s2421_s16 }
 0x4e6   : > { %1431 = vrot.lane.b32.xlu0 %v2844_v51, %s2421_s16 }
 0x54b   : > { %v1408_v44 = vpop.permute.xlu1 %1407 }
 0x54c   : > { %1421 = vst.msk [vmem:[#allocation2 + $0x10] sm:$0xff] %vm1417_vm9, %v1408_v44  ;;  %v1406_v52 = vpop.permute.xlu0 %1405 }
 0x54d   : > { %1422 = vst.msk [vmem:[#allocation2 + $0x18] sm:$0xff] %vm1419_vm3, %v1408_v44  ;;  %1420 = vst.msk [vmem:[#allocation2 + $0x8] sm:$0xff] %vm1419_vm3, %v1406_v52 }
 0x54e   : > { %1418 = vst.msk [vmem:[#allocation2] sm:$0xff] %vm1417_vm9, %v1406_v52 }
 0x54f   : > { %v1412_v53 = vpop.permute.xlu1 %1411 }
 0x550   : > { %1425 = vst.msk [vmem:[#allocation2 + $0x30] sm:$0xff] %vm1417_vm9, %v1412_v53  ;;  %v1410_v54 = vpop.permute.xlu0 %1409 }
 0x551   : > { %1426 = vst.msk [vmem:[#allocation2 + $0x38] sm:$0xff] %vm1419_vm3, %v1412_v53  ;;  %1424 = vst.msk [vmem:[#allocation2 + $0x28] sm:$0xff] %vm1419_vm3, %v1410_v54 }
 0x552   : > { %1423 = vst.msk [vmem:[#allocation2 + $0x20] sm:$0xff] %vm1417_vm9, %v1410_v54 }
 0x553   : > { %v1430_v55 = vpop.permute.xlu1 %1429  ;;  %v1453_v56 = vld [vmem:[#allocation2 + $0x10] sm:$0xff] }
 0x554   : > { %v1454_v57 = vld [vmem:[#allocation2 + $0x18] sm:$0xff]  ;;  %1441 = vst.msk [vmem:[#allocation2 + $0x50] sm:$0xff] %vm762_vm1, %v1430_v55  ;;  %v1428_v58 = vpop.permute.xlu0 %1427  ;;  %v1452_v61 = vld [vmem:[#allocation2 + $0x8] sm:$0xff] }
 0x555   : > { %1442 = vst.msk [vmem:[#allocation2 + $0x58] sm:$0xff] %vm719_vm8, %v1430_v55  ;;  %v2293_v59 = vpack.i.bf16 %v1454_v57, %v1453_v56  ;;  %v1451_v60 = vld [vmem:[#allocation2] sm:$0xff]  ;;  %1440 = vst.msk [vmem:[#allocation2 + $0x48] sm:$0xff] %vm719_vm8, %v1428_v58 }
 0x556   : > { %1439 = vst.msk [vmem:[#allocation2 + $0x40] sm:$0xff] %vm762_vm1, %v1428_v58  ;;  %v2298_v62 = vpack.i.bf16 %v1452_v61, %v1451_v60 }
 0x557   : > { %2294 = vrot.lane.b32.xlu1 %v2293_v59, %s2423_s23  ;;  %v1434_v63 = vpop.permute.xlu1 %1433  ;;  %v1457_v0 = vld [vmem:[#allocation2 + $0x30] sm:$0xff] }
 0x558   : > { %2299 = vrot.lane.b32.xlu0 %v2298_v62, %s2423_s23  ;;  %v1458_v1 = vld [vmem:[#allocation2 + $0x38] sm:$0xff]  ;;  %1445 = vst.msk [vmem:[#allocation2 + $0x70] sm:$0xff] %vm762_vm1, %v1434_v63  ;;  %v1432_v2 = vpop.permute.xlu0 %1431  ;;  %v1456_v5 = vld [vmem:[#allocation2 + $0x28] sm:$0xff] }
 0x559   : > { %1446 = vst.msk [vmem:[#allocation2 + $0x78] sm:$0xff] %vm719_vm8, %v1434_v63  ;;  %v2303_v3 = vpack.i.bf16 %v1458_v1, %v1457_v0  ;;  %v1455_v4 = vld [vmem:[#allocation2 + $0x20] sm:$0xff]  ;;  %1444 = vst.msk [vmem:[#allocation2 + $0x68] sm:$0xff] %vm719_vm8, %v1432_v2 }
 0x55a   : > { %1443 = vst.msk [vmem:[#allocation2 + $0x60] sm:$0xff] %vm762_vm1, %v1432_v2  ;;  %v2308_v6 = vpack.i.bf16 %v1456_v5, %v1455_v4 }
 0x55b   : > { %2304 = vrot.lane.b32.xlu1 %v2303_v3, %s2423_s23  ;;  %v1461_v7 = vld [vmem:[#allocation2 + $0x50] sm:$0xff] }
 0x55c   : > { %2309 = vrot.lane.b32.xlu0 %v2308_v6, %s2423_s23  ;;  %v1462_v8 = vld [vmem:[#allocation2 + $0x58] sm:$0xff]  ;;  %v1460_v11 = vld [vmem:[#allocation2 + $0x48] sm:$0xff] }
 0x55d   : > { %v2318_v9 = vpack.i.bf16 %v1462_v8, %v1461_v7  ;;  %v1459_v10 = vld [vmem:[#allocation2 + $0x40] sm:$0xff] }
 0x55e   : > { %v2313_v12 = vpack.i.bf16 %v1460_v11, %v1459_v10 }
 0x55f   : > { %2319 = vrot.lane.b32.xlu1 %v2318_v9, %s2423_s23  ;;  %v1465_v13 = vld [vmem:[#allocation2 + $0x70] sm:$0xff] }
 0x560   : > { %2314 = vrot.lane.b32.xlu0 %v2313_v12, %s2423_s23  ;;  %v1466_v14 = vld [vmem:[#allocation2 + $0x78] sm:$0xff]  ;;  %v1464_v17 = vld [vmem:[#allocation2 + $0x68] sm:$0xff] }
 0x561   : > { %v2323_v15 = vpack.i.bf16 %v1466_v14, %v1465_v13  ;;  %v1463_v16 = vld [vmem:[#allocation2 + $0x60] sm:$0xff] }
 0x562   : > { %v2328_v18 = vpack.i.bf16 %v1464_v17, %v1463_v16 }
 0x563   : > { %2324 = vrot.lane.b32.xlu1 %v2323_v15, %s2423_s23 }
 0x564   : > { %2329 = vrot.lane.b32.xlu0 %v2328_v18, %s2423_s23 }
 0x567   : > { %2339 = vrot.lane.b32.xlu1 %v2338_v21, %s2423_s23 }
 0x568   : > { %2334 = vrot.lane.b32.xlu0 %v2333_v23, %s2423_s23 }
 0x56b   : > { %2349 = vrot.lane.b32.xlu1 %v2348_v25, %s2423_s23 }
 0x56c   : > { %2344 = vrot.lane.b32.xlu0 %v2343_v26, %s2423_s23  ;;  %s2357_s23 = sshll.u32 %s2427_s24, 4  ;;  %s2358_s23 = int_to_ptr.vmem [resolvable:$false] %s2357_s23 }
 0x56d   : > { %s2359_s27 = scalar_lea.vmem %s2358_s23, 1024  ;;  %p2360_p0 = scmp.lt.s32.totalorder %s2940_s28, %s2358_s23 }
 0x56e   : > { %p2361_p1 = scmp.lt.s32.totalorder %s2359_s27, %s2353_s22 }
 0x56f   : > { %388 = vperm.xlu1 %2172, %v378_v27  }
 0x570   : > { %383 = vperm.xlu0 %2171, %v377_v28   ;;  %p2362_p2 = por %p2361_p1, %p2360_p0 }
 0x572   : > { %p2363_p3 = pnand %p2362_p2, %p2356_p13 }
 0x573   : > { %398 = vperm.xlu1 %2172, %v380_v30   ;;  %v1844_v30 = vld [vmem:[%s2998_s7 + $0x48] sm:$0xff] }
 0x574   : > { %393 = vperm.xlu0 %2171, %v379_v31   ;;  %v1845_v31 = vld [vmem:[%s2998_s7 + $0x50] sm:$0xff] }
 0x577   : > { %1492 = vperm.xlu1 %2172, %v1848_v32   ;;  %v1846_v32 = vld [vmem:[%s2998_s7 + $0x58] sm:$0xff] }
 0x578   : > { %1487 = vperm.xlu0 %2171, %v1847_v33  }
 0x57b   : > { %1502 = vperm.xlu1 %2172, %v1850_v34  }
 0x57c   : > { %1497 = vperm.xlu0 %2171, %v1849_v35  }
 0x5c9   : > { %v2295_v38 = vpop.permute.xlu1 %2294 }
 0x5ca   : > { %v2297_v40 = vunpack.i.h.bf16 %v2295_v38  ;;  %v2296_v41 = vunpack.i.l.bf16 %v2295_v38  ;;  %v2300_v43 = vpop.permute.xlu0 %2299 }
 0x5cb   : > { %v2302_v45 = vunpack.i.h.bf16 %v2300_v43  ;;  %v2301_v46 = vunpack.i.l.bf16 %v2300_v43 }
 0x5cc   : > { %v1578_v47 = vsel %vm917_vm5, %v2296_v41, %v2297_v40 }
 0x5cd   : > { %v2305_v48 = vpop.permute.xlu1 %2304  ;;  %v1577_v49 = vsel %vm917_vm5, %v2301_v46, %v2302_v45 }
 0x5ce   : > { %v2307_v50 = vunpack.i.h.bf16 %v2305_v48  ;;  %v2306_v51 = vunpack.i.l.bf16 %v2305_v48  ;;  %v2310_v44 = vpop.permute.xlu0 %2309  ;;  %v2085_v52 = vpack.c.bf16 %v1578_v47, %v1577_v49 }
 0x5cf   : > { %v2312_v53 = vunpack.i.h.bf16 %v2310_v44  ;;  %v2311_v54 = vunpack.i.l.bf16 %v2310_v44 }
 0x5d0   : > { %2086 = vmatprep.subr.bf16.mxu0 %v2085_v52  ;;  %v1580_v55 = vsel %vm917_vm5, %v2306_v51, %v2307_v50 }
 0x5d1   : > { %v2320_v56 = vpop.permute.xlu1 %2319  ;;  %2088 = vmatpush3.bf16.msra.mxu0 %v2085_v52  ;;  %v1579_v57 = vsel %vm917_vm5, %v2311_v54, %v2312_v53 }
 0x5d2   : > { %v2322_v58 = vunpack.i.h.bf16 %v2320_v56  ;;  %v2321_v59 = vunpack.i.l.bf16 %v2320_v56  ;;  %v2315_v60 = vpop.permute.xlu0 %2314  ;;  %v2089_v61 = vpack.c.bf16 %v1580_v55, %v1579_v57 }
 0x5d3   : > { %v2317_v62 = vunpack.i.h.bf16 %v2315_v60  ;;  %v2316_v63 = vunpack.i.l.bf16 %v2315_v60 }
 0x5d4   : > { %2090 = vmatprep.subr.bf16.mxu0 %v2089_v61  ;;  %v1582_v0 = vsel %vm917_vm5, %v2321_v59, %v2322_v58 }
 0x5d5   : > { %v2325_v1 = vpop.permute.xlu1 %2324  ;;  %2092 = vmatpush3.bf16.msra.mxu0 %v2089_v61  ;;  %v1581_v2 = vsel %vm917_vm5, %v2316_v63, %v2317_v62 }
 0x5d6   : > { %v2327_v3 = vunpack.i.h.bf16 %v2325_v1  ;;  %v2326_v4 = vunpack.i.l.bf16 %v2325_v1  ;;  %v2330_v5 = vpop.permute.xlu0 %2329  ;;  %v2093_v6 = vpack.c.bf16 %v1582_v0, %v1581_v2 }
 0x5d7   : > { %v2332_v7 = vunpack.i.h.bf16 %v2330_v5  ;;  %v2331_v8 = vunpack.i.l.bf16 %v2330_v5 }
 0x5d8   : > { %2094 = vmatprep.subr.bf16.mxu0 %v2093_v6  ;;  %v1584_v9 = vsel %vm917_vm5, %v2326_v4, %v2327_v3 }
 0x5d9   : > { %v2340_v10 = vpop.permute.xlu1 %2339  ;;  %2096 = vmatpush3.bf16.msra.mxu0 %v2093_v6  ;;  %v1583_v11 = vsel %vm917_vm5, %v2331_v8, %v2332_v7 }
 0x5da   : > { %v2342_v12 = vunpack.i.h.bf16 %v2340_v10  ;;  %v2341_v13 = vunpack.i.l.bf16 %v2340_v10  ;;  %v2335_v14 = vpop.permute.xlu0 %2334  ;;  %v2097_v15 = vpack.c.bf16 %v1584_v9, %v1583_v11 }
 0x5db   : > { %v2337_v16 = vunpack.i.h.bf16 %v2335_v14  ;;  %v2336_v17 = vunpack.i.l.bf16 %v2335_v14 }
 0x5dc   : > { %2098 = vmatprep.subr.bf16.mxu0 %v2097_v15  ;;  %v1586_v18 = vsel %vm917_vm5, %v2341_v13, %v2342_v12 }
 0x5dd   : > { %v2350_v19 = vpop.permute.xlu1 %2349  ;;  %2100 = vmatpush3.bf16.msra.mxu0 %v2097_v15  ;;  %v1585_v20 = vsel %vm917_vm5, %v2336_v17, %v2337_v16 }
 0x5de   : > { %v2352_v21 = vunpack.i.h.bf16 %v2350_v19  ;;  %v2351_v22 = vunpack.i.l.bf16 %v2350_v19  ;;  %v2345_v23 = vpop.permute.xlu0 %2344  ;;  %v2101_v29 = vpack.c.bf16 %v1586_v18, %v1585_v20 }
 0x5df   : > { %v2347_v24 = vunpack.i.h.bf16 %v2345_v23  ;;  %v2346_v25 = vunpack.i.l.bf16 %v2345_v23 }
 0x5e0   : > { %2102 = vmatprep.subr.bf16.mxu0 %v2101_v29  ;;  %v1588_v26 = vsel %vm917_vm5, %v2351_v22, %v2352_v21 }
 0x5e1   : > { %2104 = vmatpush3.bf16.msra.mxu0 %v2101_v29  ;;  %v1587_v27 = vsel %vm917_vm5, %v2346_v25, %v2347_v24 }
 0x5e2   : > { %v2105_v28 = vpack.c.bf16 %v1588_v26, %v1587_v27 }
 0x5e4   : > { %2106 = vmatprep.subr.bf16.mxu0 %v2105_v28 }
 0x5e5   : > { %2108 = vmatpush3.bf16.msra.mxu0 %v2105_v28 }
 0x5e8   : > { %2026 = vmatmul.mubr.msk.f32.vlgmr.msra.gmra.mrb[4].mxu0 %vm942_vm4, %v1844_v30 }
 0x5e9   : > { %2028 = vmatprep.mubr.msk.f32.mxu0 %vm942_vm4, %v1845_v31 }
 0x5ec   : > { %2029 = vmatmul.mubr.msk.f32.gmra.mrb[6].mxu0 %vm942_vm4, %v1846_v32 }
 0x5ee   : > { %v389_v33 = vpop.permute.xlu1 %388 }
 0x5ef   : > { %v384_v34 = vpop.permute.xlu0 %383  ;;  %v491_v43 = vadd.f32 %v2609_v36, %v389_v33 }
 0x5f0   : > { %v486_v45 = vadd.f32 %v2611_v37, %v384_v34 }
 0x5f2   : > { %v399_v35 = vpop.permute.xlu1 %398 }
 0x5f3   : > { %v394_v38 = vpop.permute.xlu0 %393  ;;  %v501_v50 = vadd.f32 %v2613_v39, %v399_v35 }
 0x5f4   : > { %v496_v53 = vadd.f32 %v2615_v42, %v394_v38 }
 0x5f6   : > { %v1493_v40 = vpop.permute.xlu1 %1492 }
 0x5f7   : > { %v1488_v41 = vpop.permute.xlu0 %1487  ;;  %v2110_v46 = vadd.f32 %v1493_v40, %v491_v43 }
 0x5f8   : > { %v2113_v47 = vadd.f32 %v1488_v41, %v486_v45 }
 0x5fa   : > { %v1503_v48 = vpop.permute.xlu1 %1502 }
 0x5fb   : > { %v1498_v51 = vpop.permute.xlu0 %1497  ;;  %v2116_v54 = vadd.f32 %v1503_v48, %v501_v50 }
 0x5fc   : > { %v2119_v37 = vadd.f32 %v1498_v51, %v496_v53 }
 0x6bb   : > { %v2027_v49 = vpop.f32.mrb[4].mxu0 }
 0x6bc   : > { %v2111_v44 = vadd.f32 %v2110_v46, %v2027_v49  ;;  %v1679_v52 = vpop.f32.mrb[5].mxu0 }
 0x6bd   : > { %v2114_v36 = vadd.f32 %v2113_v47, %v1679_v52 }
 0x6be   : > { %1703 = vst [vmem:[%s355_s26 + $0x8] sm:$0xff] %v2111_v44 }
 0x6bf   : > { %1702 = vst [vmem:[%s355_s26] sm:$0xff] %v2114_v36  ;;  %v2030_v55 = vpop.f32.mrb[6].mxu0 }
 0x6c0   : > { %v2117_v39 = vadd.f32 %v2116_v54, %v2030_v55  ;;  %v1689_v56 = vpop.f32.mrb[7].mxu0 }
 0x6c1   : > { %v2120_v57 = vadd.f32 %v2119_v37, %v1689_v56 }
 0x6c2   : > { %1705 = vst [vmem:[%s355_s26 + $0x18] sm:$0xff] %v2117_v39 }
 0x6c3   : > { %1704 = vst [vmem:[%s355_s26 + $0x10] sm:$0xff] %v2120_v57 }
 0x6c4   : > { %2366 = shalt.err (!%p2363_p3)
}
 0x6c5   : > { %s2367_s18 = scalar_lea.hbm %s2945_s21, 512  ;;  %s2371_s29 = scalar_lea.hbm %s3000_s9, 1024 }
 0x6c6   : > { %p2368_p4 = scmp.ne.s32.totalorder %s2945_s21, %s2367_s18  ;;  %p2372_p9 = scmp.lt.u32.totalorder %s2945_s21, %s3000_s9 }
 0x6c7   : > { %p2373_p10 = scmp.lt.u32.totalorder %s2371_s29, %s2367_s18  ;;  %p2375_p12 = scmp.lt.u32.totalorder %s2367_s18, %s2945_s21 }
 0x6c8   : > { %p2369_p7 = pnand %p2368_p4, %p2517_p5 }
 0x6c9   : > { %p2374_p11 = por %p2373_p10, %p2372_p9 }
 0x6ca   : > { %p2370_p8 = pneg %p2369_p7 }
 0x6cb   : > { %p2376_p13 = por %p2375_p12, %p2374_p11 }
 0x6cd   : > { %p2377_p0 = pnand %p2376_p13, %p2370_p8 }
 0x6cf   : > { %2380 = shalt.err (!%p2377_p0)
}
 0x6d0   : > { %s2428_s22 = smov 128  }
 0x6d1   : > { %2121 = dma.vmem_to_hbm [thread:$0]  (%p2517_p5), %s2940_s28, 512, %s2945_s21, %s2949_s13, %s2428_s22, %s2428_s22, %s2421_s16  }
 0x6d2 PF: > { %p2127_p1 = scmp.ge.s32.totalorder %s2415_s12, 2  ;;  %s1735_s24 = sand.u32 1, %s2403_s30  }
 0x6d3   : > { %s1736_s23 = scalar_lea.sflag [#allocation4], %s1735_s24 }
 0x6d4   : > { %p2124_p2 = pnand %p2127_p1, %p2521_p6 }
 0x6d6   : > { %2398 = dma.done.wait (!%p2124_p2), %s1736_s23, 512  }
 0x6d7   : > { %2400 = vsyncadd (!%p2124_p2), %s1736_s23, 4294966784  ;;  %s3004_s19 = sld [smem:[#allocation6_spill]]  ;;  %p19_p3 = scmp.ge.s32.totalorder %s2504_s15, 4  }
 0x6d8   : > { %s3005_s30 = smov %s2407_s10  ;;  %s3006_s10 = smov %s2411_s11 }
 0x6d9   : > { %s3008_s12 = smov %s2504_s15  ;;  %21 = sbr.rel (!%p19_p3) target bundleno = 3 (0x3), region = 101 }
 0x6dd   : > { %s3007_s11 = smov %s3004_s19 }
 0x6e0   :  { %1741 = vsyncpa [#allocation4], 1 }
 0x6e1   :  { %1743 = vsyncpa [#allocation4 + $0x1], 1 }

</bundles_post_ra>
